<compile_context>
chip_gen: v7x
topology: tpu7x:2x2x1
jax: 0.10.0
libtpu: 0.0.40
codegen_flags: <defaults>
</compile_context>

<pallas_src>
from functools import partial

import jax
import jax.numpy as jnp
from jax.experimental import pallas as pl
from jax.experimental.pallas import tpu as pltpu

LN_EPS = 1e-5  # torch.nn.LayerNorm default

PARAM_ORDER = (
    "a_ln_g", "a_ln_b", "w_qkv", "w_out", "b_out",
    "f_ln_g", "f_ln_b", "w1", "b1", "w2", "b2",
)


def _layernorm(x, gamma, beta):
    x = x.astype(jnp.float32)
    mean = jnp.mean(x, axis=-1, keepdims=True)
    var = jnp.mean((x - mean) ** 2, axis=-1, keepdims=True)
    return (x - mean) * jax.lax.rsqrt(var + LN_EPS) * gamma + beta


# --------------------------- fused transformer kernel ---------------------------
def transformer_kernel(x_hbm_ref,
                       a_g_ref, a_b_ref, wqkv_ref, wo_ref, bo_ref,
                       f_g_ref, f_b_ref, w1_ref, b1_ref, w2_ref, b2_ref,
                       o_ref, copy_sem, *, heads, dim_head):
    B, N, D = o_ref.shape
    H, dh = heads, dim_head
    inner = H * dh
    scale = dh ** -0.5

    # Layer 0: one-time DMA of the input (kept in HBM via pl.ANY, so it does not pin
    # a VMEM window for the whole depth loop) into the resident output block.
    @pl.when(pl.program_id(0) == 0)
    def _init():
        cp = pltpu.make_async_copy(x_hbm_ref, o_ref, copy_sem)
        cp.start()
        cp.wait()

    x = o_ref[...].astype(jnp.float32)                      # (B, N, D) resident activation

    # -------------------------------- attention --------------------------------
    xn = _layernorm(x, a_g_ref[0], a_b_ref[0])              # PreNorm, f32 stats
    xn2d = xn.reshape(B * N, D).astype(jnp.bfloat16)

    # Single lane-dense QKV matmul: (B*N, D) @ (D, 3*H*dh), bf16 in / f32 acc.
    qkv = jnp.dot(xn2d, wqkv_ref[0], preferred_element_type=jnp.float32)

    def head_slices(base):
        return [qkv[:, base + h * dh: base + (h + 1) * dh] for h in range(H)]

    def to_bh(slices):
        # (H, B*N, dh) -> (H*B, N, dh): heads+batch folded into one batched-matmul
        # axis; no weight or activation broadcasts.
        return jnp.stack(slices, axis=0).reshape(H * B, N, dh).astype(jnp.bfloat16)

    q_bh = to_bh(head_slices(0))
    k_bh = to_bh(head_slices(inner))
    v_bh = to_bh(head_slices(2 * inner))

    dots = jnp.einsum('bik,bjk->bij', q_bh, k_bh,
                      preferred_element_type=jnp.float32) * scale
    dots = dots - jnp.max(dots, axis=-1, keepdims=True)
    e = jnp.exp(dots)
    attn = e * pl.reciprocal(jnp.sum(e, axis=-1, keepdims=True), approx=True)

    ctx = jnp.einsum('bij,bjk->bik', attn.astype(jnp.bfloat16), v_bh,
                     preferred_element_type=jnp.float32)     # (H*B, N, dh)

    # Concatenated-head (B*N, H*dh) layout -> single out-projection matmul.
    ctx2d = jnp.concatenate(
        [ctx[h * B:(h + 1) * B].reshape(B * N, dh) for h in range(H)], axis=-1)
    proj = jnp.dot(ctx2d.astype(jnp.bfloat16), wo_ref[0],
                   preferred_element_type=jnp.float32)       # (B*N, D)
    x = x + proj.reshape(B, N, D) + bo_ref[0]                # to_out bias + residual

    # ------------------------------ feed-forward ------------------------------
    xn2 = _layernorm(x, f_g_ref[0], f_b_ref[0]).reshape(B * N, D).astype(jnp.bfloat16)
    hid = jnp.dot(xn2, w1_ref[0], preferred_element_type=jnp.float32) + b1_ref[0]
    # exact (erf-based) GELU, matching torch.nn.GELU default
    hid = 0.5 * hid * (1.0 + jax.lax.erf(hid * (2.0 ** -0.5)))
    y = jnp.dot(hid.astype(jnp.bfloat16), w2_ref[0],
                preferred_element_type=jnp.float32) + b2_ref[0]
    x = x + y.reshape(B, N, D)                               # residual

    o_ref[...] = x.astype(o_ref.dtype)


# ----------------------------------- wrapper -----------------------------------
def transformer_forward(x, params, pos_emb=None, apply_pos_emb_fn=None,
                        *, heads, dim_head):
    # pos_emb / apply_pos_emb_fn kept for API parity; apply_pos_emb_fn is None here.
    del pos_emb, apply_pos_emb_fn
    B, N, D = x.shape
    depth = params["a_ln_g"].shape[0]

    def weight_spec(shape):
        nd = len(shape)
        blk = (1,) + tuple(shape[1:])
        return pl.BlockSpec(blk, lambda l, _nd=nd: (l,) + (0,) * (_nd - 1))

    out_spec = pl.BlockSpec((B, N, D), lambda l: (0, 0, 0))  # resident across depth

    kernel = partial(transformer_kernel, heads=heads, dim_head=dim_head)
    return pl.pallas_call(
        kernel,
        out_shape=jax.ShapeDtypeStruct((B, N, D), x.dtype),   # resident activation dtype
        grid=(depth,),
        in_specs=[pl.BlockSpec(memory_space=pl.ANY)]           # x stays in HBM
                 + [weight_spec(params[k].shape) for k in PARAM_ORDER],
        out_specs=out_spec,
        scratch_shapes=[pltpu.SemaphoreType.DMA],              # one-time x copy
        compiler_params=pltpu.CompilerParams(
            dimension_semantics=("arbitrary",),                # layers are sequential
            # Above the 16/32 MiB scoped defaults (v5e/v6e,v7x), under v7x's 64 MiB
            # physical.  Raise to ~96 MiB on v6e / K-tile MLP on v7x at real ViT sizes.
            vmem_limit_bytes=48 * 1024 * 1024,
        ),
    )(x, *[params[k] for k in PARAM_ORDER])


# --------------------------- parameter construction ---------------------------
def init_transformer_params(key, dim, depth, heads, dim_head, mlp_dim):
    inner = heads * dim_head
    ks = jax.random.split(key, 6)

    def bf16w(k, shape, s=0.02):
        # matmul weights stored bf16 (halves DMA + VMEM; MXU runs native bf16 rate)
        return (s * jax.random.normal(k, shape, jnp.float32)).astype(jnp.bfloat16)

    return {
        "a_ln_g": jnp.ones((depth, 1, dim), jnp.float32),
        "a_ln_b": jnp.zeros((depth, 1, dim), jnp.float32),
        # to_qkv (bias=False), fused + lane-dense: (depth, dim, 3*heads*dim_head)
        "w_qkv": bf16w(ks[0], (depth, dim, 3 * inner)),
        # to_out Linear on concatenated heads: (depth, heads*dim_head, dim)
        "w_out": bf16w(ks[1], (depth, inner, dim)),
        "b_out": 0.01 * jax.random.normal(ks[2], (depth, 1, dim), jnp.float32),
        "f_ln_g": jnp.ones((depth, 1, dim), jnp.float32),
        "f_ln_b": jnp.zeros((depth, 1, dim), jnp.float32),
        "w1": bf16w(ks[3], (depth, dim, mlp_dim)),
        "b1": 0.01 * jax.random.normal(ks[4], (depth, 1, mlp_dim), jnp.float32),
        "w2": bf16w(ks[5], (depth, mlp_dim, dim)),
        "b2": jnp.zeros((depth, 1, dim), jnp.float32),
    }


# ------------------------------ pure-JAX reference ------------------------------
def reference_forward(x, params, heads, dim_head):
    depth = params["a_ln_g"].shape[0]
    H, dh = heads, dim_head
    inner = H * dh
    scale = dh ** -0.5
    B, N, D = x.shape
    for l in range(depth):
        xn = _layernorm(x, params["a_ln_g"][l], params["a_ln_b"][l])
        qkv = jnp.einsum('bnd,dm->bnm', xn, params["w_qkv"][l].astype(jnp.float32))
        q = qkv[..., :inner].reshape(B, N, H, dh).transpose(0, 2, 1, 3)
        k = qkv[..., inner:2 * inner].reshape(B, N, H, dh).transpose(0, 2, 1, 3)
        v = qkv[..., 2 * inner:].reshape(B, N, H, dh).transpose(0, 2, 1, 3)
        dots = jnp.einsum('bhik,bhjk->bhij', q, k) * scale
        attn = jax.nn.softmax(dots, axis=-1)
        ctx = jnp.einsum('bhij,bhjk->bhik', attn, v)
        ctx = ctx.transpose(0, 2, 1, 3).reshape(B, N, inner)
        proj = ctx @ params["w_out"][l].astype(jnp.float32) + params["b_out"][l]
        x = x + proj
        xn = _layernorm(x, params["f_ln_g"][l], params["f_ln_b"][l])
        h = xn @ params["w1"][l].astype(jnp.float32) + params["b1"][l]
        h = 0.5 * h * (1.0 + jax.lax.erf(h * (2.0 ** -0.5)))
        y = h @ params["w2"][l].astype(jnp.float32) + params["b2"][l]
        x = x + y
    return x


if __name__ == "__main__":
    B, N, DIM = 2, 8, 32
    HEADS, DIM_HEAD, MLP_DIM, DEPTH = 4, 8, 64, 2

    key = jax.random.PRNGKey(0)
    kx, kp, kpe = jax.random.split(key, 3)
    x = jax.random.normal(kx, (B, N, DIM), jnp.float32)
    pos_emb = jax.random.normal(kpe, (N, DIM_HEAD), jnp.float32)  # unused (fn=None)

    params = init_transformer_params(kp, DIM, DEPTH, HEADS, DIM_HEAD, MLP_DIM)

    out = transformer_forward(x, params, pos_emb=pos_emb, apply_pos_emb_fn=None,
                              heads=HEADS, dim_head=DIM_HEAD)
    out = jax.block_until_ready(out)

    ref = reference_forward(x, params, HEADS, DIM_HEAD)
    assert out.shape == (B, N, DIM)
    assert bool(jnp.all(jnp.isfinite(out)))
    err = float(jnp.max(jnp.abs(out - ref)))
    assert err < 1e-2, err  # bf16 matmul operands + approx-reciprocal softmax tol
    print("KERNEL_OK")
</pallas_src>

<mosaic_0001>
module attributes {stable_mosaic.version = 11 : i64} {
  func.func @transformer_kernel(%arg0: i32, %arg1: memref<2x8x32xf32, #tpu.memory_space<any>>, %arg2: memref<1x1x32xf32, #tpu.memory_space<vmem>>, %arg3: memref<1x1x32xf32, #tpu.memory_space<vmem>>, %arg4: memref<1x32x96xbf16, #tpu.memory_space<vmem>>, %arg5: memref<1x32x32xbf16, #tpu.memory_space<vmem>>, %arg6: memref<1x1x32xf32, #tpu.memory_space<vmem>>, %arg7: memref<1x1x32xf32, #tpu.memory_space<vmem>>, %arg8: memref<1x1x32xf32, #tpu.memory_space<vmem>>, %arg9: memref<1x32x64xbf16, #tpu.memory_space<vmem>>, %arg10: memref<1x1x64xf32, #tpu.memory_space<vmem>>, %arg11: memref<1x64x32xbf16, #tpu.memory_space<vmem>>, %arg12: memref<1x1x32xf32, #tpu.memory_space<vmem>>, %arg13: memref<2x8x32xf32, #tpu.memory_space<vmem>>, %arg14: memref<!tpu.dma_semaphore, #tpu.memory_space<semaphore_mem>>) attributes {dimension_semantics = [#tpu.dimension_semantics<arbitrary>], iteration_bounds = array<i64: 2>, scalar_prefetch = 0 : i64, scratch_operands = 1 : i64, tpu.core_type = #tpu.core_type<tc>, window_params = [{}, {transform_indices = @transform_1, window_bounds = array<i64: 1, 1, 32>}, {transform_indices = @transform_2, window_bounds = array<i64: 1, 1, 32>}, {transform_indices = @transform_3, window_bounds = array<i64: 1, 32, 96>}, {transform_indices = @transform_4, window_bounds = array<i64: 1, 32, 32>}, {transform_indices = @transform_5, window_bounds = array<i64: 1, 1, 32>}, {transform_indices = @transform_6, window_bounds = array<i64: 1, 1, 32>}, {transform_indices = @transform_7, window_bounds = array<i64: 1, 1, 32>}, {transform_indices = @transform_8, window_bounds = array<i64: 1, 32, 64>}, {transform_indices = @transform_9, window_bounds = array<i64: 1, 1, 64>}, {transform_indices = @transform_10, window_bounds = array<i64: 1, 64, 32>}, {transform_indices = @transform_11, window_bounds = array<i64: 1, 1, 32>}, {pipeline_mode = #tpu.pipeline_mode<synchronous>, transform_indices = @transform_12, window_bounds = array<i64: 2, 8, 32>}]} {
    %c0_i32 = arith.constant 0 : i32
    %0 = arith.cmpi eq, %arg0, %c0_i32 : i32
    %1 = arith.extui %0 : i1 to i32
    %c0_i32_0 = arith.constant 0 : i32
    %2 = arith.cmpi ne, %1, %c0_i32_0 : i32
    scf.if %2 {
      tpu.enqueue_dma source(%arg1 : memref<2x8x32xf32, #tpu.memory_space<any>>) target(%arg13 : memref<2x8x32xf32, #tpu.memory_space<vmem>>) target_semaphore(%arg14 : memref<!tpu.dma_semaphore, #tpu.memory_space<semaphore_mem>>)
      tpu.wait_dma2 semaphore(%arg14 : memref<!tpu.dma_semaphore, #tpu.memory_space<semaphore_mem>>) src(%arg1 : memref<2x8x32xf32, #tpu.memory_space<any>>) dst(%arg13 : memref<2x8x32xf32, #tpu.memory_space<vmem>>)
    } else {
    }
    %c0 = arith.constant 0 : index
    %c0_1 = arith.constant 0 : index
    %c0_2 = arith.constant 0 : index
    %3 = vector.load %arg13[%c0, %c0_1, %c0_2] : memref<2x8x32xf32, #tpu.memory_space<vmem>>, vector<2x8x32xf32>
    %c0_3 = arith.constant 0 : index
    %c0_4 = arith.constant 0 : index
    %c0_5 = arith.constant 0 : index
    %4 = vector.load %arg2[%c0_3, %c0_4, %c0_5] : memref<1x1x32xf32, #tpu.memory_space<vmem>>, vector<1x1x32xf32>
    %5 = vector.shape_cast %4 : vector<1x1x32xf32> to vector<1x32xf32>
    %c0_6 = arith.constant 0 : index
    %c0_7 = arith.constant 0 : index
    %c0_8 = arith.constant 0 : index
    %6 = vector.load %arg3[%c0_6, %c0_7, %c0_8] : memref<1x1x32xf32, #tpu.memory_space<vmem>>, vector<1x1x32xf32>
    %7 = vector.shape_cast %6 : vector<1x1x32xf32> to vector<1x32xf32>
    %cst = arith.constant dense<0.000000e+00> : vector<2x8xf32>
    %8 = vector.multi_reduction <add>, %3, %cst [2] : vector<2x8x32xf32> to vector<2x8xf32>
    %9 = vector.shape_cast %8 : vector<2x8xf32> to vector<2x8x1xf32>
    %cst_9 = arith.constant 3.200000e+01 : f32
    %10 = vector.broadcast %cst_9 : f32 to vector<2x8x1xf32>
    %11 = arith.divf %9, %10 : vector<2x8x1xf32>
    %12 = vector.broadcast %11 : vector<2x8x1xf32> to vector<2x8x32xf32>
    %13 = arith.subf %3, %12 : vector<2x8x32xf32>
    %14 = arith.mulf %13, %13 : vector<2x8x32xf32>
    %cst_10 = arith.constant dense<0.000000e+00> : vector<2x8xf32>
    %15 = vector.multi_reduction <add>, %14, %cst_10 [2] : vector<2x8x32xf32> to vector<2x8xf32>
    %16 = vector.shape_cast %15 : vector<2x8xf32> to vector<2x8x1xf32>
    %cst_11 = arith.constant 3.200000e+01 : f32
    %17 = vector.broadcast %cst_11 : f32 to vector<2x8x1xf32>
    %18 = arith.divf %16, %17 : vector<2x8x1xf32>
    %19 = vector.broadcast %11 : vector<2x8x1xf32> to vector<2x8x32xf32>
    %20 = arith.subf %3, %19 : vector<2x8x32xf32>
    %cst_12 = arith.constant 9.99999974E-6 : f32
    %21 = vector.broadcast %cst_12 : f32 to vector<2x8x1xf32>
    %22 = arith.addf %18, %21 : vector<2x8x1xf32>
    %23 = math.rsqrt %22 : vector<2x8x1xf32>
    %24 = vector.broadcast %23 : vector<2x8x1xf32> to vector<2x8x32xf32>
    %25 = arith.mulf %20, %24 : vector<2x8x32xf32>
    %26 = vector.shape_cast %5 : vector<1x32xf32> to vector<1x1x32xf32>
    %27 = vector.broadcast %26 : vector<1x1x32xf32> to vector<2x8x32xf32>
    %28 = arith.mulf %25, %27 : vector<2x8x32xf32>
    %29 = vector.shape_cast %7 : vector<1x32xf32> to vector<1x1x32xf32>
    %30 = vector.broadcast %29 : vector<1x1x32xf32> to vector<2x8x32xf32>
    %31 = arith.addf %28, %30 : vector<2x8x32xf32>
    %32 = vector.shape_cast %31 : vector<2x8x32xf32> to vector<16x32xf32>
    %33 = arith.truncf %32 : vector<16x32xf32> to vector<16x32xbf16>
    %c0_13 = arith.constant 0 : index
    %c0_14 = arith.constant 0 : index
    %c0_15 = arith.constant 0 : index
    %34 = vector.load %arg4[%c0_13, %c0_14, %c0_15] : memref<1x32x96xbf16, #tpu.memory_space<vmem>>, vector<1x32x96xbf16>
    %35 = vector.shape_cast %34 : vector<1x32x96xbf16> to vector<32x96xbf16>
    %cst_16 = arith.constant dense<0.000000e+00> : vector<16x96xf32>
    %36 = tpu.matmul %33, %35, %cst_16 {dimension_numbers = #tpu.dot_dimension_numbers<[1], [0], [0], [1], [0, 0, 1, 1], [], []>} : vector<16x32xbf16>, vector<32x96xbf16>, vector<16x96xf32> -> vector<16x96xf32>
    %37 = vector.extract_strided_slice %36 {offsets = [0, 0], sizes = [16, 8], strides = [1, 1]} : vector<16x96xf32> to vector<16x8xf32>
    %38 = vector.extract_strided_slice %36 {offsets = [0, 8], sizes = [16, 8], strides = [1, 1]} : vector<16x96xf32> to vector<16x8xf32>
    %39 = vector.extract_strided_slice %36 {offsets = [0, 16], sizes = [16, 8], strides = [1, 1]} : vector<16x96xf32> to vector<16x8xf32>
    %40 = vector.extract_strided_slice %36 {offsets = [0, 24], sizes = [16, 8], strides = [1, 1]} : vector<16x96xf32> to vector<16x8xf32>
    %41 = vector.shape_cast %37 : vector<16x8xf32> to vector<1x16x8xf32>
    %42 = vector.shape_cast %38 : vector<16x8xf32> to vector<1x16x8xf32>
    %43 = vector.shape_cast %39 : vector<16x8xf32> to vector<1x16x8xf32>
    %44 = vector.shape_cast %40 : vector<16x8xf32> to vector<1x16x8xf32>
    %45 = tpu.concatenate %41, %42, %43, %44 in 0 : vector<1x16x8xf32>, vector<1x16x8xf32>, vector<1x16x8xf32>, vector<1x16x8xf32> -> vector<4x16x8xf32>
    %46 = vector.shape_cast %45 : vector<4x16x8xf32> to vector<8x8x8xf32>
    %47 = arith.truncf %46 : vector<8x8x8xf32> to vector<8x8x8xbf16>
    %48 = vector.extract_strided_slice %36 {offsets = [0, 32], sizes = [16, 8], strides = [1, 1]} : vector<16x96xf32> to vector<16x8xf32>
    %49 = vector.extract_strided_slice %36 {offsets = [0, 40], sizes = [16, 8], strides = [1, 1]} : vector<16x96xf32> to vector<16x8xf32>
    %50 = vector.extract_strided_slice %36 {offsets = [0, 48], sizes = [16, 8], strides = [1, 1]} : vector<16x96xf32> to vector<16x8xf32>
    %51 = vector.extract_strided_slice %36 {offsets = [0, 56], sizes = [16, 8], strides = [1, 1]} : vector<16x96xf32> to vector<16x8xf32>
    %52 = vector.shape_cast %48 : vector<16x8xf32> to vector<1x16x8xf32>
    %53 = vector.shape_cast %49 : vector<16x8xf32> to vector<1x16x8xf32>
    %54 = vector.shape_cast %50 : vector<16x8xf32> to vector<1x16x8xf32>
    %55 = vector.shape_cast %51 : vector<16x8xf32> to vector<1x16x8xf32>
    %56 = tpu.concatenate %52, %53, %54, %55 in 0 : vector<1x16x8xf32>, vector<1x16x8xf32>, vector<1x16x8xf32>, vector<1x16x8xf32> -> vector<4x16x8xf32>
    %57 = vector.shape_cast %56 : vector<4x16x8xf32> to vector<8x8x8xf32>
    %58 = arith.truncf %57 : vector<8x8x8xf32> to vector<8x8x8xbf16>
    %59 = vector.extract_strided_slice %36 {offsets = [0, 64], sizes = [16, 8], strides = [1, 1]} : vector<16x96xf32> to vector<16x8xf32>
    %60 = vector.extract_strided_slice %36 {offsets = [0, 72], sizes = [16, 8], strides = [1, 1]} : vector<16x96xf32> to vector<16x8xf32>
    %61 = vector.extract_strided_slice %36 {offsets = [0, 80], sizes = [16, 8], strides = [1, 1]} : vector<16x96xf32> to vector<16x8xf32>
    %62 = vector.extract_strided_slice %36 {offsets = [0, 88], sizes = [16, 8], strides = [1, 1]} : vector<16x96xf32> to vector<16x8xf32>
    %63 = vector.shape_cast %59 : vector<16x8xf32> to vector<1x16x8xf32>
    %64 = vector.shape_cast %60 : vector<16x8xf32> to vector<1x16x8xf32>
    %65 = vector.shape_cast %61 : vector<16x8xf32> to vector<1x16x8xf32>
    %66 = vector.shape_cast %62 : vector<16x8xf32> to vector<1x16x8xf32>
    %67 = tpu.concatenate %63, %64, %65, %66 in 0 : vector<1x16x8xf32>, vector<1x16x8xf32>, vector<1x16x8xf32>, vector<1x16x8xf32> -> vector<4x16x8xf32>
    %68 = vector.shape_cast %67 : vector<4x16x8xf32> to vector<8x8x8xf32>
    %69 = arith.truncf %68 : vector<8x8x8xf32> to vector<8x8x8xbf16>
    "tpu.trace_start"() <{level = 10 : i32, message = "bik,bjk->bij"}> : () -> ()
    %cst_17 = arith.constant dense<0.000000e+00> : vector<8x8x8xf32>
    %70 = tpu.matmul %47, %58, %cst_17 {dimension_numbers = #tpu.dot_dimension_numbers<[2], [2], [1], [1], [0, 0, 0, 1, 1, 1], [0], [0]>} : vector<8x8x8xbf16>, vector<8x8x8xbf16>, vector<8x8x8xf32> -> vector<8x8x8xf32>
    "tpu.trace_stop"() : () -> ()
    %cst_18 = arith.constant 0.353553385 : f32
    %71 = vector.broadcast %cst_18 : f32 to vector<8x8x8xf32>
    %72 = arith.mulf %70, %71 : vector<8x8x8xf32>
    %cst_19 = arith.constant dense<0xFF800000> : vector<8x8xf32>
    %73 = vector.multi_reduction <maximumf>, %72, %cst_19 [2] : vector<8x8x8xf32> to vector<8x8xf32>
    %74 = vector.shape_cast %73 : vector<8x8xf32> to vector<8x8x1xf32>
    %75 = vector.broadcast %74 : vector<8x8x1xf32> to vector<8x8x8xf32>
    %76 = arith.subf %72, %75 : vector<8x8x8xf32>
    %77 = math.exp %76 : vector<8x8x8xf32>
    %cst_20 = arith.constant dense<0.000000e+00> : vector<8x8xf32>
    %78 = vector.multi_reduction <add>, %77, %cst_20 [2] : vector<8x8x8xf32> to vector<8x8xf32>
    %79 = vector.shape_cast %78 : vector<8x8xf32> to vector<8x8x1xf32>
    %80 = tpu.reciprocal %79 {approx = true} : vector<8x8x1xf32> -> vector<8x8x1xf32>
    %81 = vector.broadcast %80 : vector<8x8x1xf32> to vector<8x8x8xf32>
    %82 = arith.mulf %77, %81 : vector<8x8x8xf32>
    %83 = arith.truncf %82 : vector<8x8x8xf32> to vector<8x8x8xbf16>
    "tpu.trace_start"() <{level = 10 : i32, message = "bij,bjk->bik"}> : () -> ()
    %cst_21 = arith.constant dense<0.000000e+00> : vector<8x8x8xf32>
    %84 = tpu.matmul %83, %69, %cst_21 {dimension_numbers = #tpu.dot_dimension_numbers<[2], [1], [1], [2], [0, 0, 0, 1, 1, 2], [0], [0]>} : vector<8x8x8xbf16>, vector<8x8x8xbf16>, vector<8x8x8xf32> -> vector<8x8x8xf32>
    "tpu.trace_stop"() : () -> ()
    %85 = vector.extract_strided_slice %84 {offsets = [0, 0, 0], sizes = [2, 8, 8], strides = [1, 1, 1]} : vector<8x8x8xf32> to vector<2x8x8xf32>
    %86 = vector.shape_cast %85 : vector<2x8x8xf32> to vector<16x8xf32>
    %87 = vector.extract_strided_slice %84 {offsets = [2, 0, 0], sizes = [2, 8, 8], strides = [1, 1, 1]} : vector<8x8x8xf32> to vector<2x8x8xf32>
    %88 = vector.shape_cast %87 : vector<2x8x8xf32> to vector<16x8xf32>
    %89 = vector.extract_strided_slice %84 {offsets = [4, 0, 0], sizes = [2, 8, 8], strides = [1, 1, 1]} : vector<8x8x8xf32> to vector<2x8x8xf32>
    %90 = vector.shape_cast %89 : vector<2x8x8xf32> to vector<16x8xf32>
    %91 = vector.extract_strided_slice %84 {offsets = [6, 0, 0], sizes = [2, 8, 8], strides = [1, 1, 1]} : vector<8x8x8xf32> to vector<2x8x8xf32>
    %92 = vector.shape_cast %91 : vector<2x8x8xf32> to vector<16x8xf32>
    %93 = tpu.concatenate %86, %88, %90, %92 in 1 : vector<16x8xf32>, vector<16x8xf32>, vector<16x8xf32>, vector<16x8xf32> -> vector<16x32xf32>
    %94 = arith.truncf %93 : vector<16x32xf32> to vector<16x32xbf16>
    %c0_22 = arith.constant 0 : index
    %c0_23 = arith.constant 0 : index
    %c0_24 = arith.constant 0 : index
    %95 = vector.load %arg5[%c0_22, %c0_23, %c0_24] : memref<1x32x32xbf16, #tpu.memory_space<vmem>>, vector<1x32x32xbf16>
    %96 = vector.shape_cast %95 : vector<1x32x32xbf16> to vector<32x32xbf16>
    %cst_25 = arith.constant dense<0.000000e+00> : vector<16x32xf32>
    %97 = tpu.matmul %94, %96, %cst_25 {dimension_numbers = #tpu.dot_dimension_numbers<[1], [0], [0], [1], [0, 0, 1, 1], [], []>} : vector<16x32xbf16>, vector<32x32xbf16>, vector<16x32xf32> -> vector<16x32xf32>
    %98 = vector.shape_cast %97 : vector<16x32xf32> to vector<2x8x32xf32>
    %99 = arith.addf %3, %98 : vector<2x8x32xf32>
    %c0_26 = arith.constant 0 : index
    %c0_27 = arith.constant 0 : index
    %c0_28 = arith.constant 0 : index
    %100 = vector.load %arg6[%c0_26, %c0_27, %c0_28] : memref<1x1x32xf32, #tpu.memory_space<vmem>>, vector<1x1x32xf32>
    %101 = vector.shape_cast %100 : vector<1x1x32xf32> to vector<1x32xf32>
    %102 = vector.shape_cast %101 : vector<1x32xf32> to vector<1x1x32xf32>
    %103 = vector.broadcast %102 : vector<1x1x32xf32> to vector<2x8x32xf32>
    %104 = arith.addf %99, %103 : vector<2x8x32xf32>
    %c0_29 = arith.constant 0 : index
    %c0_30 = arith.constant 0 : index
    %c0_31 = arith.constant 0 : index
    %105 = vector.load %arg7[%c0_29, %c0_30, %c0_31] : memref<1x1x32xf32, #tpu.memory_space<vmem>>, vector<1x1x32xf32>
    %106 = vector.shape_cast %105 : vector<1x1x32xf32> to vector<1x32xf32>
    %c0_32 = arith.constant 0 : index
    %c0_33 = arith.constant 0 : index
    %c0_34 = arith.constant 0 : index
    %107 = vector.load %arg8[%c0_32, %c0_33, %c0_34] : memref<1x1x32xf32, #tpu.memory_space<vmem>>, vector<1x1x32xf32>
    %108 = vector.shape_cast %107 : vector<1x1x32xf32> to vector<1x32xf32>
    %cst_35 = arith.constant dense<0.000000e+00> : vector<2x8xf32>
    %109 = vector.multi_reduction <add>, %104, %cst_35 [2] : vector<2x8x32xf32> to vector<2x8xf32>
    %110 = vector.shape_cast %109 : vector<2x8xf32> to vector<2x8x1xf32>
    %cst_36 = arith.constant 3.200000e+01 : f32
    %111 = vector.broadcast %cst_36 : f32 to vector<2x8x1xf32>
    %112 = arith.divf %110, %111 : vector<2x8x1xf32>
    %113 = vector.broadcast %112 : vector<2x8x1xf32> to vector<2x8x32xf32>
    %114 = arith.subf %104, %113 : vector<2x8x32xf32>
    %115 = arith.mulf %114, %114 : vector<2x8x32xf32>
    %cst_37 = arith.constant dense<0.000000e+00> : vector<2x8xf32>
    %116 = vector.multi_reduction <add>, %115, %cst_37 [2] : vector<2x8x32xf32> to vector<2x8xf32>
    %117 = vector.shape_cast %116 : vector<2x8xf32> to vector<2x8x1xf32>
    %cst_38 = arith.constant 3.200000e+01 : f32
    %118 = vector.broadcast %cst_38 : f32 to vector<2x8x1xf32>
    %119 = arith.divf %117, %118 : vector<2x8x1xf32>
    %120 = vector.broadcast %112 : vector<2x8x1xf32> to vector<2x8x32xf32>
    %121 = arith.subf %104, %120 : vector<2x8x32xf32>
    %cst_39 = arith.constant 9.99999974E-6 : f32
    %122 = vector.broadcast %cst_39 : f32 to vector<2x8x1xf32>
    %123 = arith.addf %119, %122 : vector<2x8x1xf32>
    %124 = math.rsqrt %123 : vector<2x8x1xf32>
    %125 = vector.broadcast %124 : vector<2x8x1xf32> to vector<2x8x32xf32>
    %126 = arith.mulf %121, %125 : vector<2x8x32xf32>
    %127 = vector.shape_cast %106 : vector<1x32xf32> to vector<1x1x32xf32>
    %128 = vector.broadcast %127 : vector<1x1x32xf32> to vector<2x8x32xf32>
    %129 = arith.mulf %126, %128 : vector<2x8x32xf32>
    %130 = vector.shape_cast %108 : vector<1x32xf32> to vector<1x1x32xf32>
    %131 = vector.broadcast %130 : vector<1x1x32xf32> to vector<2x8x32xf32>
    %132 = arith.addf %129, %131 : vector<2x8x32xf32>
    %133 = vector.shape_cast %132 : vector<2x8x32xf32> to vector<16x32xf32>
    %134 = arith.truncf %133 : vector<16x32xf32> to vector<16x32xbf16>
    %c0_40 = arith.constant 0 : index
    %c0_41 = arith.constant 0 : index
    %c0_42 = arith.constant 0 : index
    %135 = vector.load %arg9[%c0_40, %c0_41, %c0_42] : memref<1x32x64xbf16, #tpu.memory_space<vmem>>, vector<1x32x64xbf16>
    %136 = vector.shape_cast %135 : vector<1x32x64xbf16> to vector<32x64xbf16>
    %cst_43 = arith.constant dense<0.000000e+00> : vector<16x64xf32>
    %137 = tpu.matmul %134, %136, %cst_43 {dimension_numbers = #tpu.dot_dimension_numbers<[1], [0], [0], [1], [0, 0, 1, 1], [], []>} : vector<16x32xbf16>, vector<32x64xbf16>, vector<16x64xf32> -> vector<16x64xf32>
    %c0_44 = arith.constant 0 : index
    %c0_45 = arith.constant 0 : index
    %c0_46 = arith.constant 0 : index
    %138 = vector.load %arg10[%c0_44, %c0_45, %c0_46] : memref<1x1x64xf32, #tpu.memory_space<vmem>>, vector<1x1x64xf32>
    %139 = vector.shape_cast %138 : vector<1x1x64xf32> to vector<1x64xf32>
    %140 = vector.broadcast %139 : vector<1x64xf32> to vector<16x64xf32>
    %141 = arith.addf %137, %140 : vector<16x64xf32>
    %cst_47 = arith.constant 5.000000e-01 : f32
    %142 = vector.broadcast %cst_47 : f32 to vector<16x64xf32>
    %143 = arith.mulf %142, %141 : vector<16x64xf32>
    %cst_48 = arith.constant 0.707106769 : f32
    %144 = vector.broadcast %cst_48 : f32 to vector<16x64xf32>
    %145 = arith.mulf %141, %144 : vector<16x64xf32>
    %146 = math.erf %145 : vector<16x64xf32>
    %cst_49 = arith.constant 1.000000e+00 : f32
    %147 = vector.broadcast %cst_49 : f32 to vector<16x64xf32>
    %148 = arith.addf %147, %146 : vector<16x64xf32>
    %149 = arith.mulf %143, %148 : vector<16x64xf32>
    %150 = arith.truncf %149 : vector<16x64xf32> to vector<16x64xbf16>
    %c0_50 = arith.constant 0 : index
    %c0_51 = arith.constant 0 : index
    %c0_52 = arith.constant 0 : index
    %151 = vector.load %arg11[%c0_50, %c0_51, %c0_52] : memref<1x64x32xbf16, #tpu.memory_space<vmem>>, vector<1x64x32xbf16>
    %152 = vector.shape_cast %151 : vector<1x64x32xbf16> to vector<64x32xbf16>
    %cst_53 = arith.constant dense<0.000000e+00> : vector<16x32xf32>
    %153 = tpu.matmul %150, %152, %cst_53 {dimension_numbers = #tpu.dot_dimension_numbers<[1], [0], [0], [1], [0, 0, 1, 1], [], []>} : vector<16x64xbf16>, vector<64x32xbf16>, vector<16x32xf32> -> vector<16x32xf32>
    %c0_54 = arith.constant 0 : index
    %c0_55 = arith.constant 0 : index
    %c0_56 = arith.constant 0 : index
    %154 = vector.load %arg12[%c0_54, %c0_55, %c0_56] : memref<1x1x32xf32, #tpu.memory_space<vmem>>, vector<1x1x32xf32>
    %155 = vector.shape_cast %154 : vector<1x1x32xf32> to vector<1x32xf32>
    %156 = vector.broadcast %155 : vector<1x32xf32> to vector<16x32xf32>
    %157 = arith.addf %153, %156 : vector<16x32xf32>
    %158 = vector.shape_cast %157 : vector<16x32xf32> to vector<2x8x32xf32>
    %159 = arith.addf %104, %158 : vector<2x8x32xf32>
    %c0_57 = arith.constant 0 : index
    %c0_58 = arith.constant 0 : index
    %c0_59 = arith.constant 0 : index
    %160 = vector.load %arg13[%c0_57, %c0_58, %c0_59] : memref<2x8x32xf32, #tpu.memory_space<vmem>>, vector<2x8x32xf32>
    tpu.vector_store %arg13[%c0_57, %c0_58, %c0_59], %159 {strides = array<i32>} : memref<2x8x32xf32, #tpu.memory_space<vmem>>, vector<2x8x32xf32>,
    return
  }
  func.func @transform_1(%arg0: i32) -> (i32, i32, i32) {
    %c0_i32 = arith.constant 0 : i32
    %c0_i32_0 = arith.constant 0 : i32
    %c0_i32_1 = arith.constant 0 : i32
    return %arg0, %c0_i32, %c0_i32_0 : i32, i32, i32
  }
  func.func @transform_2(%arg0: i32) -> (i32, i32, i32) {
    %c0_i32 = arith.constant 0 : i32
    %c0_i32_0 = arith.constant 0 : i32
    %c0_i32_1 = arith.constant 0 : i32
    return %arg0, %c0_i32, %c0_i32_0 : i32, i32, i32
  }
  func.func @transform_3(%arg0: i32) -> (i32, i32, i32) {
    %c0_i32 = arith.constant 0 : i32
    %c0_i32_0 = arith.constant 0 : i32
    %c0_i32_1 = arith.constant 0 : i32
    return %arg0, %c0_i32, %c0_i32_0 : i32, i32, i32
  }
  func.func @transform_4(%arg0: i32) -> (i32, i32, i32) {
    %c0_i32 = arith.constant 0 : i32
    %c0_i32_0 = arith.constant 0 : i32
    %c0_i32_1 = arith.constant 0 : i32
    return %arg0, %c0_i32, %c0_i32_0 : i32, i32, i32
  }
  func.func @transform_5(%arg0: i32) -> (i32, i32, i32) {
    %c0_i32 = arith.constant 0 : i32
    %c0_i32_0 = arith.constant 0 : i32
    %c0_i32_1 = arith.constant 0 : i32
    return %arg0, %c0_i32, %c0_i32_0 : i32, i32, i32
  }
  func.func @transform_6(%arg0: i32) -> (i32, i32, i32) {
    %c0_i32 = arith.constant 0 : i32
    %c0_i32_0 = arith.constant 0 : i32
    %c0_i32_1 = arith.constant 0 : i32
    return %arg0, %c0_i32, %c0_i32_0 : i32, i32, i32
  }
  func.func @transform_7(%arg0: i32) -> (i32, i32, i32) {
    %c0_i32 = arith.constant 0 : i32
    %c0_i32_0 = arith.constant 0 : i32
    %c0_i32_1 = arith.constant 0 : i32
    return %arg0, %c0_i32, %c0_i32_0 : i32, i32, i32
  }
  func.func @transform_8(%arg0: i32) -> (i32, i32, i32) {
    %c0_i32 = arith.constant 0 : i32
    %c0_i32_0 = arith.constant 0 : i32
    %c0_i32_1 = arith.constant 0 : i32
    return %arg0, %c0_i32, %c0_i32_0 : i32, i32, i32
  }
  func.func @transform_9(%arg0: i32) -> (i32, i32, i32) {
    %c0_i32 = arith.constant 0 : i32
    %c0_i32_0 = arith.constant 0 : i32
    %c0_i32_1 = arith.constant 0 : i32
    return %arg0, %c0_i32, %c0_i32_0 : i32, i32, i32
  }
  func.func @transform_10(%arg0: i32) -> (i32, i32, i32) {
    %c0_i32 = arith.constant 0 : i32
    %c0_i32_0 = arith.constant 0 : i32
    %c0_i32_1 = arith.constant 0 : i32
    return %arg0, %c0_i32, %c0_i32_0 : i32, i32, i32
  }
  func.func @transform_11(%arg0: i32) -> (i32, i32, i32) {
    %c0_i32 = arith.constant 0 : i32
    %c0_i32_0 = arith.constant 0 : i32
    %c0_i32_1 = arith.constant 0 : i32
    return %arg0, %c0_i32, %c0_i32_0 : i32, i32, i32
  }
  func.func @transform_12(%arg0: i32) -> (i32, i32, i32) {
    %c0_i32 = arith.constant 0 : i32
    %c0_i32_0 = arith.constant 0 : i32
    %c0_i32_1 = arith.constant 0 : i32
    %c0_i32_2 = arith.constant 0 : i32
    return %c0_i32, %c0_i32_0, %c0_i32_1 : i32, i32, i32
  }
}

</mosaic_0001>

<bundles_post_ra>
// kernel: tpu_custom_call.1
= control target key start
LH: loop header
LB: loop body
LE: loop exit
PB: predicated region body
PF: predicated region fallthrough
CT: control target
= control target key end

     0   :  { %s3456_s0 = inlined_call_operand.hbm [shape: f32[2,8,32], index: 0, kind: input, shape index: {}]   ;;  %s3457_s1 = inlined_call_operand.vmem [shape: f32[2,1,32], index: 1, kind: input, shape index: {}]   ;;  %s3458_s2 = inlined_call_operand.vmem [shape: f32[2,1,32], index: 2, kind: input, shape index: {}]   ;;  %s3459_s3 = inlined_call_operand.vmem [shape: bf16[2,32,96], index: 3, kind: input, shape index: {}]   ;;  %s3460_s4 = inlined_call_operand.vmem [shape: bf16[2,32,32], index: 4, kind: input, shape index: {}]   ;;  %s3461_s5 = inlined_call_operand.hbm [shape: f32[2,1,32], index: 5, kind: input, shape index: {}]   ;;  %s3462_s6 = inlined_call_operand.hbm [shape: f32[2,1,32], index: 6, kind: input, shape index: {}]   ;;  %s3463_s7 = inlined_call_operand.hbm [shape: f32[2,1,32], index: 7, kind: input, shape index: {}]   ;;  %s3464_s8 = inlined_call_operand.vmem [shape: bf16[2,32,64], index: 8, kind: input, shape index: {}]   ;;  %s3465_s9 = inlined_call_operand.hbm [shape: f32[2,1,64], index: 9, kind: input, shape index: {}]   ;;  %s3466_s10 = inlined_call_operand.vmem [shape: bf16[2,64,32], index: 10, kind: input, shape index: {}]   ;;  %s3467_s11 = inlined_call_operand.vmem [shape: f32[2,1,32], index: 11, kind: input, shape index: {}]   ;;  %s3468_s12 = inlined_call_operand.hbm [shape: f32[2,8,32], index: 12, kind: output, shape index: {}]  }
   0x1   :  { %3478 = sst [smem:[#allocation24_spill]] %s3456_s0 }
   0x2   :  { %3479 = sst [smem:[#allocation25_spill]] %s3459_s3 }
   0x3   :  { %3480 = sst [smem:[#allocation26_spill]] %s3460_s4 }
   0x4   :  { %3481 = sst [smem:[#allocation27_spill]] %s3461_s5 }
   0x5   :  { %3482 = sst [smem:[#allocation28_spill]] %s3462_s6 }
   0x6   :  { %3483 = sst [smem:[#allocation29_spill]] %s3463_s7 }
   0x7   :  { %3484 = sst [smem:[#allocation30_spill]] %s3468_s12 }
   0x8   :  { %17 = vsyncpa [#allocation4], 0 }
   0x9   :  { %19 = vsyncpa [#allocation4 + $0x1], 0 }
   0xa   :  { %20 = vsyncpa [#allocation7], 0 }
   0xb   :  { %22 = vsyncpa [#allocation7 + $0x1], 0 }
   0xc   :  { %23 = vsyncpa [#allocation10], 0 }
   0xd   :  { %25 = vsyncpa [#allocation10 + $0x1], 0 }
   0xe   :  { %26 = vsyncpa [#allocation5], 0  ;;  %s2863_s21 = smov 0   ;;  %s2865_s22 = smov 0  }
   0xf   :  { %s2867_s23 = smov 0   ;;  %s2869_s24 = smov 0  }
  0x10 LB: > { %3485 = sst [smem:[#allocation21_spill]] %s2776_s23  ;;  %s2882_s25 = sadd.s32 4294967295, %s2780_s24   ;;  %s2780_s24 = sphi %s2869_s24, %s3518_s24   ;;  %s2776_s23 = sphi %s2867_s23, %s3520_s23   ;;  %s2772_s22 = sphi %s2865_s22, %s3522_s22   ;;  %s2768_s21 = sphi %s2863_s21, %s3521_s21  }
  0x11   : > { %s2885_s26 = sadd.s32 1, %s2780_s24   ;;  %s143_s28 = sadd.s32 1, %s2776_s23 }
  0x12   : > { %3486 = sst [smem:[#allocation22_spill]] %s2885_s26  ;;  %s140_s27 = ssub.s32 %s2780_s24, %s2885_s26 }
  0x13   : > { %p141_p0 = scmp.eq.s32.totalorder %s140_s27, 0  ;;  %p150_p1 = scmp.ne.s32.totalorder %s2776_s23, %s2772_s22 }
  0x14   : > { %p151_p2 = scmp.eq.s32.totalorder %s2780_s24, 0  ;;  %p156_p3 = scmp.ne.s32.totalorder %s2772_s22, %s2768_s21 }
  0x15   : > { %s2895_s29 = scalar_select %p141_p0, %s2776_s23, %s143_s28  }
  0x16   : > { %p152_p4 = por %p151_p2, %p150_p1  ;;  %p3472_p5 = scmp.eq.s32.totalorder %s2882_s25, 0 }
  0x17   : > { %3487 = sst [smem:[#allocation23_spill]] %s2895_s29  ;;  %p2426_p6 = scmp.lt.s32.totalorder %s2780_s24, 2 }
  0x18   : > { %p2901_p7 = por %p3472_p5, %p156_p3  ;;  %s2906_s13 = sand.u32 1, %s2776_s23  }
  0x19   : > { %s2909_s14 = sshll.u32 %s2780_s24, 4  ;;  %p2911_p8 = pnand %p2426_p6, %p152_p4 }
  0x1a   : > { %s3488_s30 = scalar_select %p2901_p7, 1, 0 }
  0x1b   : > { %s3489_s15 = scalar_select %p2911_p8, 1, 0 }
  0x1c   : > { %s402_s16 = sand.u32 1, %s2780_s24   ;;  %s3490_s6 = sld [smem:[#allocation28_spill]] }
  0x1d   : > { %s405_s20 = scalar_lea.vmem [#allocation6], %s2906_s13  ;;  %s2926_s27 = scalar_lea.sflag [#allocation7], %s402_s16 }
  0x1e   : > { %s412_s21 = sshll.u32 %s405_s20, 4  ;;  %p2932_p11 = pneg %p2911_p8  ;;  %s2923_s21 = int_to_ptr.vmem [resolvable:$true] %s412_s21 }
  0x22   : > { %s2920_s19 = scalar_lea.hbm %s3490_s6, %s2909_s14  ;;  %s2563_s20 = scalar_lea.hbm %s3490_s6, 32 }
  0x23   : > { %s2558_s28 = scalar_lea.hbm %s2920_s19, 16  ;;  %p2564_p0 = scmp.lt.u32.totalorder %s2920_s19, %s3490_s6 }
  0x24   : > { %p2559_p10 = scmp.ne.s32.totalorder %s2920_s19, %s2558_s28  ;;  %p2565_p1 = scmp.lt.u32.totalorder %s2563_s20, %s2558_s28 }
  0x25   : > { %p2567_p3 = scmp.lt.u32.totalorder %s2558_s28, %s2920_s19 }
  0x26   : > { %p2561_p12 = pnand %p2932_p11, %p2559_p10  ;;  %p2566_p2 = por %p2565_p1, %p2564_p0 }
  0x28   : > { %p2562_p13 = pneg %p2561_p12  ;;  %p2568_p4 = por %p2567_p3, %p2566_p2 }
  0x2a   : > { %p2569_p6 = pnand %p2568_p4, %p2562_p13 }
  0x2c   : > { %2572 = shalt.err (!%p2569_p6)
}
  0x2d   : > { %s2573_s16 = scalar_lea.vmem %s2923_s21, 16  ;;  %s2782_s17 = smov [#allocation6]  }
  0x2e   : > { %p2574_p10 = scmp.ne.s32.totalorder %s2923_s21, %s2573_s16  ;;  %s2578_s18 = sshll.u32 %s2782_s17, 4  ;;  %s2579_s18 = int_to_ptr.vmem [resolvable:$false] %s2578_s18 }
  0x2f   : > { %s2580_s23 = scalar_lea.vmem %s2579_s18, 32  ;;  %p2581_p9 = scmp.lt.s32.totalorder %s2923_s21, %s2579_s18 }
  0x30   : > { %p2576_p12 = pnand %p2574_p10, %p2932_p11  ;;  %p2582_p7 = scmp.lt.s32.totalorder %s2580_s23, %s2573_s16 }
  0x32   : > { %p2577_p5 = pneg %p2576_p12  ;;  %p2583_p0 = por %p2582_p7, %p2581_p9 }
  0x34   : > { %p2584_p1 = pnand %p2583_p0, %p2577_p5 }
  0x36   : > { %2587 = shalt.err (!%p2584_p1)
}
  0x37   : > { %2419 = dma.hbm_to_vmem [thread:$0]  (!%p2911_p8), %s2920_s19, 16, %s2923_s21, %s2926_s27  }
  0x38   : > { %p473_p13 = scmp.lt.s32.totalorder %s2780_s24, 3  ;;  %s3492_s5 = sld [smem:[#allocation27_spill]] }
  0x39   : > { %p3493_p5 = scmp.ge.s32.totalorder %s2780_s24, 1  ;;  %s388_s17 = scalar_lea.vmem [#allocation3], %s2906_s13 }
  0x3a   : > { %s395_s18 = sshll.u32 %s388_s17, 4  ;;  %s386_s23 = scalar_lea.sflag [#allocation4], %s2906_s13  ;;  %s396_s18 = int_to_ptr.vmem [resolvable:$true] %s395_s18 }
  0x3b   : > { %p2965_p7 = pnand %p3493_p5, %p473_p13 }
  0x3d   : > { %s3494_s16 = scalar_select %p2965_p7, 1, 0 }
  0x3e   : > { %s2961_s20 = scalar_lea.hbm %s3492_s5, %s2909_s14  ;;  %s2593_s24 = scalar_lea.hbm %s3492_s5, 32 }
  0x3f   : > { %s2588_s19 = scalar_lea.hbm %s2961_s20, 16  ;;  %p2594_p4 = scmp.lt.u32.totalorder %s2961_s20, %s3492_s5 }
  0x40   : > { %p2589_p9 = scmp.ne.s32.totalorder %s2961_s20, %s2588_s19  ;;  %p2595_p6 = scmp.lt.u32.totalorder %s2593_s24, %s2588_s19 }
  0x41   : > { %p2597_p12 = scmp.lt.u32.totalorder %s2588_s19, %s2961_s20 }
  0x42   : > { %p2591_p2 = pnand %p2589_p9, %p2932_p11  ;;  %p2596_p10 = por %p2595_p6, %p2594_p4 }
  0x44   : > { %p2592_p3 = pneg %p2591_p2  ;;  %p2598_p0 = por %p2597_p12, %p2596_p10 }
  0x46   : > { %p2599_p1 = pnand %p2598_p0, %p2592_p3 }
  0x48   : > { %2602 = shalt.err (!%p2599_p1)
}
  0x49   : > { %s2603_s17 = scalar_lea.vmem %s396_s18, 16  ;;  %s2783_s12 = smov [#allocation3]  }
  0x4a   : > { %p2604_p13 = scmp.ne.s32.totalorder %s396_s18, %s2603_s17  ;;  %s2608_s0 = sshll.u32 %s2783_s12, 4  ;;  %s2609_s0 = int_to_ptr.vmem [resolvable:$false] %s2608_s0 }
  0x4b   : > { %s2610_s21 = scalar_lea.vmem %s2609_s0, 32  ;;  %p2611_p2 = scmp.lt.s32.totalorder %s396_s18, %s2609_s0 }
  0x4c   : > { %p2606_p5 = pnand %p2604_p13, %p2932_p11  ;;  %p2612_p7 = scmp.lt.s32.totalorder %s2610_s21, %s2603_s17 }
  0x4e   : > { %p2607_p9 = pneg %p2606_p5  ;;  %p2613_p8 = por %p2612_p7, %p2611_p2 }
  0x50   : > { %p2614_p4 = pnand %p2613_p8, %p2607_p9 }
  0x52   : > { %2617 = shalt.err (!%p2614_p4)
}
  0x53   : > { %p3495_p6 = scmp.ne.s32.totalorder %s3489_s15, 0  ;;  %s3496_s7 = sld [smem:[#allocation29_spill]] }
  0x54   : > { %s422_s0 = scalar_lea.vmem [#allocation8], %s2906_s13 }
  0x55   : > { %2416 = dma.hbm_to_vmem [thread:$0]  (!%p3495_p6), %s2961_s20, 16, %s396_s18, %s386_s23  }
  0x56   : > { %s429_s12 = sshll.u32 %s422_s0, 4  ;;  %s430_s12 = int_to_ptr.vmem [resolvable:$true] %s429_s12 }
  0x59   : > { %s2992_s26 = scalar_lea.hbm %s3496_s7, %s2909_s14  ;;  %s2623_s20 = scalar_lea.hbm %s3496_s7, 32 }
  0x5a   : > { %s2618_s24 = scalar_lea.hbm %s2992_s26, 16  ;;  %p2624_p10 = scmp.lt.u32.totalorder %s2992_s26, %s3496_s7 }
  0x5b   : > { %p2619_p8 = scmp.ne.s32.totalorder %s2992_s26, %s2618_s24  ;;  %p2625_p12 = scmp.lt.u32.totalorder %s2623_s20, %s2618_s24 }
  0x5c   : > { %p2627_p1 = scmp.lt.u32.totalorder %s2618_s24, %s2992_s26 }
  0x5d   : > { %p2621_p7 = pnand %p2619_p8, %p2932_p11  ;;  %p2626_p0 = por %p2625_p12, %p2624_p10 }
  0x5f   : > { %p2622_p3 = pneg %p2621_p7  ;;  %p2628_p13 = por %p2627_p1, %p2626_p0 }
  0x61   : > { %p2629_p5 = pnand %p2628_p13, %p2622_p3 }
  0x63   : > { %2632 = shalt.err (!%p2629_p5)
}
  0x64   : > { %s2633_s21 = scalar_lea.vmem %s430_s12, 16  ;;  %s2784_s6 = smov [#allocation8]  }
  0x65   : > { %p2634_p9 = scmp.ne.s32.totalorder %s430_s12, %s2633_s21  ;;  %s2638_s19 = sshll.u32 %s2784_s6, 4  ;;  %s2639_s19 = int_to_ptr.vmem [resolvable:$false] %s2638_s19 }
  0x66   : > { %s2640_s0 = scalar_lea.vmem %s2639_s19, 32  ;;  %p2641_p8 = scmp.lt.s32.totalorder %s430_s12, %s2639_s19 }
  0x67   : > { %p2636_p2 = pnand %p2634_p9, %p2932_p11  ;;  %p2642_p7 = scmp.lt.s32.totalorder %s2640_s0, %s2633_s21 }
  0x69   : > { %p2637_p4 = pneg %p2636_p2  ;;  %p2643_p6 = por %p2642_p7, %p2641_p8 }
  0x6b   : > { %p2644_p10 = pnand %p2643_p6, %p2637_p4 }
  0x6d   : > { %2647 = shalt.err (!%p2644_p10)
}
  0x6e   : > { %p3497_p12 = scmp.ne.s32.totalorder %s3489_s15, 0  ;;  %s3017_s17 = scalar_lea.hbm %s3465_s9, %s2909_s14 }
  0x6f   : > { %s447_s20 = scalar_lea.vmem [#allocation9], %s2906_s13  ;;  %s445_s23 = scalar_lea.sflag [#allocation10], %s2906_s13 }
  0x70   : > { %2422 = dma.hbm_to_vmem [thread:$0]  (!%p3497_p12), %s2992_s26, 16, %s430_s12, %s2926_s27  }
  0x71   : > { %s454_s18 = sshll.u32 %s447_s20, 4  ;;  %s2648_s21 = scalar_lea.hbm %s3017_s17, 16  ;;  %s455_s18 = int_to_ptr.vmem [resolvable:$true] %s454_s18 }
  0x72   : > { %p2649_p6 = scmp.ne.s32.totalorder %s3017_s17, %s2648_s21  ;;  %s2653_s26 = scalar_lea.hbm %s3465_s9, 32 }
  0x73   : > { %p2654_p1 = scmp.lt.u32.totalorder %s3017_s17, %s3465_s9  ;;  %p2655_p13 = scmp.lt.u32.totalorder %s2653_s26, %s2648_s21 }
  0x74   : > { %p2651_p3 = pnand %p2649_p6, %p2932_p11  ;;  %p2657_p9 = scmp.lt.u32.totalorder %s2648_s21, %s3017_s17 }
  0x75   : > { %p2656_p5 = por %p2655_p13, %p2654_p1 }
  0x76   : > { %p2652_p0 = pneg %p2651_p3 }
  0x77   : > { %p2658_p2 = por %p2657_p9, %p2656_p5 }
  0x79   : > { %p2659_p4 = pnand %p2658_p2, %p2652_p0 }
  0x7b   : > { %2662 = shalt.err (!%p2659_p4)
}
  0x7c   : > { %s2663_s13 = scalar_lea.vmem %s455_s18, 16  ;;  %s2785_s19 = smov [#allocation9]  }
  0x7d   : > { %p2664_p8 = scmp.ne.s32.totalorder %s455_s18, %s2663_s13  ;;  %s2668_s0 = sshll.u32 %s2785_s19, 4  ;;  %s2669_s0 = int_to_ptr.vmem [resolvable:$false] %s2668_s0 }
  0x7e   : > { %s2670_s24 = scalar_lea.vmem %s2669_s0, 32  ;;  %p2671_p6 = scmp.lt.s32.totalorder %s455_s18, %s2669_s0 }
  0x7f   : > { %p2666_p7 = pnand %p2664_p8, %p2932_p11  ;;  %p2672_p3 = scmp.lt.s32.totalorder %s2670_s24, %s2663_s13 }
  0x81   : > { %p2667_p10 = pneg %p2666_p7  ;;  %p2673_p12 = por %p2672_p3, %p2671_p6 }
  0x83   : > { %p2674_p1 = pnand %p2673_p12, %p2667_p10 }
  0x85   : > { %2677 = shalt.err (!%p2674_p1)
}
  0x86   : > { %p3498_p13 = scmp.ne.s32.totalorder %s3489_s15, 0  ;;  %p3499_p0 = scmp.ne.s32.totalorder %s3494_s16, 0 }
  0x87   : > { %s3041_s29 = sand.u32 (!%p3499_p0), 1, %s2772_s22   ;;  %p3500_p11 = scmp.ne.s32.totalorder (!%p3499_p0), %s3488_s30, 0 }
  0x88   : > { %2425 = dma.hbm_to_vmem [thread:$0]  (!%p3498_p13), %s3017_s17, 16, %s455_s18, %s445_s23  }
  0x89   : > { %477 = sbr.rel (%p3499_p0) target bundleno = 2903 (0xb57), region = 64  ;;  %s480_s28 = scalar_lea.sflag (!%p3499_p0), [#allocation4], %s3041_s29 }
  0x90   : > { %2747 = dma.done.wait (%p3500_p11), %s480_s28, 16  }
  0x91   : > { %2749 = vsyncadd (%p3500_p11), %s480_s28, 4294967280  ;;  %s487_s15 = sand.u32 1, %s2882_s25  }
  0x92   : > { %s488_s17 = scalar_lea.sflag [#allocation7], %s487_s15 }
  0x93   : > { %2751 = dma.done.wait (%p3500_p11), %s488_s17, 32  }
  0x94   : > { %2753 = vsyncadd (%p3500_p11), %s488_s17, 4294967264  ;;  %s504_s23 = scalar_lea.sflag [#allocation10], %s3041_s29 }
  0x95   : > { %2755 = dma.done.wait (%p3500_p11), %s504_s23, 16  }
  0x96   : > { %2757 = vsyncadd (%p3500_p11), %s504_s23, 4294967280  ;;  %p580_p12 = scmp.lt.s32.totalorder %s2882_s25, 1  ;;  %s2786_s27 = smov [#allocation11]  }
  0x97   : > { %s621_s26 = sshll.u32 %s2786_s27, 4  ;;  %s3501_s3 = sld [smem:[#allocation25_spill]]  ;;  %s3100_s26 = int_to_ptr.vmem [resolvable:$true] %s621_s26 }
  0x98   : > { %s3064_s6 = scalar_select %p580_p12, %s2882_s25, 1 }
  0x99   : > { %s3502_s4 = sld [smem:[#allocation26_spill]]  ;;  %s3503_s21 = sld [smem:[#allocation24_spill]] }
  0x9a   : > { %s2216_s24 = sshll.u32 %s3064_s6, 4  ;;  %s2219_s28 = sshll.u32 %s3064_s6, 5 }
  0x9b   : > { %s3089_s12 = scalar_lea.vmem %s3464_s8, %s2216_s24  ;;  %s3094_s30 = scalar_lea.vmem %s3466_s10, %s2219_s28 }
  0x9c   : > { %s608_s15 = scalar_lea.vmem %s3467_s11, %s3064_s6  ;;  %p3505_p9 = scmp.eq.s32.totalorder %s2882_s25, 0 }
  0x9d   : > { %s3079_s23 = scalar_lea.vmem %s3501_s3, %s2216_s24 }
  0x9f   : > { %s3084_s16 = scalar_lea.vmem %s3502_s4, %s2216_s24  ;;  %s3504_s3 = smov %s3503_s21 }
  0xa0   : > { %s2678_s4 = scalar_lea.hbm %s3503_s21, 256 }
  0xa1   : > { %p2679_p5 = scmp.ne.s32.totalorder %s3504_s3, %s2678_s4  ;;  %p2684_p8 = scmp.lt.u32.totalorder %s2678_s4, %s3504_s3 }
  0xa3   : > { %p2680_p2 = pnand %p2679_p5, %p3505_p9 }
  0xa5   : > { %p2681_p4 = pneg %p2680_p2 }
  0xa7   : > { %p2686_p7 = pnand %p2684_p8, %p2681_p4 }
  0xa9   : > { %2689 = shalt.err (!%p2686_p7)  }
  0xaa   : > { %s3114_s13 = scalar_lea.vmem %s3100_s26, 256  ;;  %p3506_p6 = pmov %p3505_p9 }
  0xab   : > { %p2691_p10 = scmp.ne.s32.totalorder %s3100_s26, %s3114_s13  ;;  %p2697_p13 = scmp.lt.s32.totalorder %s3100_s26, %s3100_s26 }
  0xac   : > { %p2698_p0 = scmp.lt.s32.totalorder %s3114_s13, %s3114_s13 }
  0xad   : > { %p2692_p3 = pnand %p2691_p10, %p3506_p6 }
  0xae   : > { %p3127_p11 = por %p2698_p0, %p2697_p13 }
  0xaf   : > { %p2693_p1 = pneg %p2692_p3 }
  0xb1   : > { %p2700_p12 = pnand %p3127_p11, %p2693_p1 }
  0xb3   : > { %2703 = shalt.err (!%p2700_p12)  }
  0xb4   : > { %p3508_p5 = pmov %p3506_p6 }
  0xb6   : > { %2407 = dma.hbm_to_vmem [thread:$0]  (%p3508_p5), %s3504_s3, 256, %s3100_s26, [#allocation2] }
  0xb7   : > { %p3509_p9 = pmov %p3508_p5 }
  0xb8   : > { %p3510_p2 = pmov %p3508_p5 }
  0xb9   : > { %2759 = dma.done.wait (%p3509_p9), [#allocation2], 256 }
  0xba   : > { %2761 = vsyncadd (%p3510_p2), [#allocation2], 4294967040  ;;  %vm633_vm0 = vcmask 261120   ;;  %v3143_v0 = vld [vmem:[#allocation11] sm:$0xff]  ;;  %v3145_v1 = vld [vmem:[#allocation11 + $0x8] sm:$0xff]  ;;  %v2787_v15 = vmov 0.0   ;;  %s3512_s19 = scalar_lea.vmem %s3458_s2, %s3064_s6 }
  0xbb   : > { %v634_v2 = vsel %vm633_vm0, %v3143_v0, 0.0  ;;  %v637_v3 = vsel %vm633_vm0, %v3145_v1, 0.0  ;;  %v2504_v14 = vld [vmem:[%s3079_s23] sm:$0xff]   ;;  %2266 = vmatprep.subr.bf16.mxu0 %v2787_v15  ;;  %2274 = vmatprep.subr.bf16.mxu1 %v2787_v15  ;;  %v2505_v16 = vld [vmem:[%s3079_s23 + $0x8] sm:$0xff]   ;;  %vm2788_vm1 = vmmov 0   ;;  %s3511_s23 = scalar_lea.vmem %s3457_s1, %s3064_s6  ;;  %s2789_s17 = smov 112  }
  0xbc   : > { %635 = vadd.xlane.f32.xlu0 %v634_v2  ;;  %2267 = vmatpush3.bf16.msra.mxu0 %v2504_v14  ;;  %v2174_v25 = vld [vmem:[%s3511_s23] ss:$0 sm:$0xff]  ;;  %s2790_s18 = smov 120   ;;  %s2791_s21 = smov 104   ;;  %vm769_vm2 = vcmask 64512   ;;  %vm1268_vm3 = vcmask 1043456  }
  0xbd   : > { %2270 = vmatprep.mubr.msk.bf16.mxu0 %vm2788_vm1, %v2787_v15  ;;  %2268 = vmatprep.subr.bf16.mxu0 %v2787_v15  ;;  %v2175_v29 = vld [vmem:[%s3512_s19] ss:$0 sm:$0xff]  ;;  %s2792_s20 = smov 96   ;;  %s2793_s24 = smov 64   ;;  %vm1674_vm4 = vcmask 130048   ;;  %vm1677_vm5 = vcmask 195584  }
  0xbe   : > { %2276 = vmatprep.mubr.msk.bf16.mxu1 %vm2788_vm1, %v2787_v15  ;;  %s2794_s5 = smov 8   ;;  %s2795_s7 = smov 16   ;;  %vm1914_vm6 = vcmask 523264  }
  0xbf   : > { %s2796_s0 = smov 24   ;;  %s3514_s28 = scalar_lea.vmem [#allocation6], %s3041_s29 }
  0xc0   : > { %638 = vadd.xlane.f32.xlu0 %v637_v3  ;;  %2269 = vmatpush3.bf16.msra.mxu0 %v2505_v16  ;;  %s3516_s23 = scalar_lea.vmem [#allocation9], %s3041_s29  ;;  %p2428_p4 = scmp.eq.s32.totalorder %s2882_s25, 1 }
  0xc1   : > { %2280 = vmatprep.subr.bf16.mxu0 %v2787_v15 }
  0xc2   : > { %p2706_p8 = pnand %p2691_p10, %p2428_p4 }
  0xc4   : > { %p2707_p7 = pneg %p2706_p8 }
  0xc6   : > { %p2714_p6 = pnand %p2707_p7, %p3127_p11 }
 0x149   : > { %v636_v4 = vpop.xlane.xlu0 %635 }
 0x14a   : > { %v641_v5 = vmul.f32 0.03125, %v636_v4 }
 0x14c   : > { %v643_v6 = vsub.f32 %v3143_v0, %v641_v5 }
 0x14d   : > { %v639_v7 = vpop.xlane.xlu0 %638 }
 0x14e   : > { %v642_v8 = vmul.f32 0.03125, %v639_v7  ;;  %v645_v9 = vmul.f32 %v643_v6, %v643_v6 }
 0x150   : > { %v644_v10 = vsub.f32 %v3145_v1, %v642_v8  ;;  %v647_v11 = vsel %vm633_vm0, %v645_v9, 0.0 }
 0x151   : > { %648 = vadd.xlane.f32.xlu1 %v647_v11 }
 0x152   : > { %v646_v12 = vmul.f32 %v644_v10, %v644_v10 }
 0x154   : > { %v650_v13 = vsel %vm633_vm0, %v646_v12, 0.0 }
 0x155   : > { %651 = vadd.xlane.f32.xlu1 %v650_v13 }
 0x1de   : > { %v649_v17 = vpop.xlane.xlu1 %648 }
 0x1df   : > { %v653_v18 = vmul.f32 0.03125, %v649_v17 }
 0x1e1   : > { %v655_v19 = vadd.f32 1e-05, %v653_v18 }
 0x1e2   : > { %v652_v20 = vpop.xlane.xlu1 %651 }
 0x1e3   : > { %2514 = vrsqrt.f32 %v655_v19  ;;  %v654_v21 = vmul.f32 0.03125, %v652_v20 }
 0x1e5   : > { %v656_v22 = vadd.f32 1e-05, %v654_v21 }
 0x1e7   : > { %2516 = vrsqrt.f32 %v656_v22 }
 0x1ed   : > { %v2515_v23 = vpop.eup %2514 }
 0x1ee   : > { %v659_v24 = vmul.f32 %v2515_v23, %v643_v6 }
 0x1f0   : > { %v667_v28 = vmul.f32 %v2174_v25, %v659_v24 }
 0x1f1   : > { %v2517_v26 = vpop.eup %2516 }
 0x1f2   : > { %v660_v27 = vmul.f32 %v2517_v26, %v644_v10  ;;  %v675_v31 = vadd.f32 %v2175_v29, %v667_v28 }
 0x1f4   : > { %v668_v30 = vmul.f32 %v2174_v25, %v660_v27 }
 0x1f6   : > { %v676_v32 = vadd.f32 %v2175_v29, %v668_v30 }
 0x1f8   : > { %v677_v33 = vpack.c.bf16 %v676_v32, %v675_v31 }
 0x1fa   : > { %2271 = vmatmul.mubr.msk.bf16.vlgmr.msra.gmra.mrb[0].mxu0 %vm633_vm0, %v677_v33 }
 0x1fb   : > { %2282 = vmatprep.mubr.msk.bf16.mxu0 %vm2788_vm1, %v2787_v15 }
 0x2cd   : > { %v731_v34 = vpop.f32.mrb[0].mxu0 }
 0x2ce   : > { %v2272_v35 = vpop.f32.mrb[1].mxu0  ;;  %v758_v40 = vpack.c.bf16 %v731_v34, %v731_v34 }
 0x2cf   : > { %v734_v36 = vpop.f32.mrb[2].mxu0 }
 0x2d0   : > { %v2273_v37 = vpop.f32.mrb[3].mxu0  ;;  %v2479_v38 = vpack.i.bf16 %v734_v36, %v731_v34  ;;  %v3178_v39 = vpack.c.bf16 %v734_v36, %v734_v36 }
 0x2d2   : > { %2480 = vrot.lane.b32.xlu1 %v2479_v38, %s2789_s17  ;;  %2475 = vrot.lane.b32.xlu0 %v2479_v38, %s2790_s18 }
 0x2d6   : > { %2485 = vrot.lane.b32.xlu1 %v2479_v38, %s2791_s21  ;;  %817 = vrot.lane.b32.xlu0 %v3178_v39, %s2792_s20 }
 0x2da   : > { %767 = vrot.lane.b32.xlu1 %v758_v40, %s2792_s20 }
 0x344   : > { %v2481_v41 = vpop.permute.xlu1 %2480  ;;  %v2476_v42 = vpop.permute.xlu0 %2475 }
 0x345   : > { %v2478_v43 = vunpack.i.h.bf16 %v2476_v42  ;;  %v2477_v44 = vunpack.i.l.bf16 %v2476_v42  ;;  %v2483_v45 = vunpack.i.h.bf16 %v2481_v41  ;;  %v2482_v46 = vunpack.i.l.bf16 %v2481_v41 }
 0x347   : > { %v3183_v47 = vpack.c.bf16 %v2478_v43, %v2478_v43  ;;  %v3185_v48 = vpack.c.bf16 %v2477_v44, %v2477_v44  ;;  %v3192_v52 = vpack.c.bf16 %v2483_v45, %v2483_v45  ;;  %v3194_v53 = vpack.c.bf16 %v2482_v46, %v2482_v46 }
 0x348   : > { %v2486_v49 = vpop.permute.xlu1 %2485  ;;  %v818_v50 = vpop.permute.xlu0 %817 }
 0x349   : > { %v823_v51 = vsel %vm769_vm2, %v818_v50, 0  ;;  %866 = vrot.lane.b32.xlu1 %v3185_v48, %s2792_s20  ;;  %915 = vrot.lane.b32.xlu0 %v3183_v47, %s2792_s20  ;;  %v2488_v54 = vunpack.i.h.bf16 %v2486_v49  ;;  %v2487_v55 = vunpack.i.l.bf16 %v2486_v49 }
 0x34a   : > { %2281 = vmatpush3.bf16.xpose.msra.mxu0 %v823_v51 }
 0x34b   : > { %2292 = vmatprep.subr.bf16.mxu0 %v2787_v15  ;;  %v3202_v58 = vpack.c.bf16 %v2488_v54, %v2488_v54  ;;  %v3204_v59 = vpack.c.bf16 %v2487_v55, %v2487_v55 }
 0x34c   : > { %v768_v56 = vpop.permute.xlu1 %767 }
 0x34d   : > { %964 = vrot.lane.b32.xlu1 %v3194_v53, %s2792_s20  ;;  %1013 = vrot.lane.b32.xlu0 %v3192_v52, %s2792_s20  ;;  %v774_v57 = vsel %vm769_vm2, %v768_v56, 0 }
 0x34e   : > { %2275 = vmatpush3.bf16.xpose.msra.mxu1 %v774_v57 }
 0x34f   : > { %2286 = vmatprep.subr.bf16.mxu1 %v2787_v15 }
 0x351   : > { %1062 = vrot.lane.b32.xlu1 %v3204_v59, %s2792_s20  ;;  %1111 = vrot.lane.b32.xlu0 %v3202_v58, %s2792_s20 }
 0x352   : > { %2283 = vmatmul.mubr.msk.bf16.vlgmr.msra.gmra.mrb[4].mxu0 %vm769_vm2, %v3178_v39 }
 0x353   : > { %2294 = vmatprep.mubr.msk.bf16.mxu0 %vm2788_vm1, %v2787_v15 }
 0x355   : > { %2277 = vmatmul.mubr.msk.bf16.vlgmr.msra.gmra.mrb[0].mxu1 %vm769_vm2, %v758_v40  ;;  %1263 = vrot.lane.b32.xlu1 %v758_v40, %s2793_s24 }
 0x356   : > { %2288 = vmatprep.mubr.msk.bf16.mxu1 %vm2788_vm1, %v2787_v15 }
 0x3bb   : > { %v867_v60 = vpop.permute.xlu1 %866  ;;  %v916_v61 = vpop.permute.xlu0 %915 }
 0x3bc   : > { %v872_v62 = vsel %vm769_vm2, %v867_v60, 0  ;;  %v921_v63 = vsel %vm769_vm2, %v916_v61, 0 }
 0x3bd   : > { %2287 = vmatpush3.bf16.xpose.msra.mxu1 %v872_v62  ;;  %2293 = vmatpush3.bf16.xpose.msra.mxu0 %v921_v63 }
 0x3be   : > { %2298 = vmatprep.subr.bf16.mxu1 %v2787_v15  ;;  %2304 = vmatprep.subr.bf16.mxu0 %v2787_v15 }
 0x3bf   : > { %v965_v2 = vpop.permute.xlu1 %964  ;;  %v1014_v3 = vpop.permute.xlu0 %1013 }
 0x3c0   : > { %v970_v4 = vsel %vm769_vm2, %v965_v2, 0  ;;  %v1019_v5 = vsel %vm769_vm2, %v1014_v3, 0 }
 0x3c3   : > { %v1063_v6 = vpop.permute.xlu1 %1062  ;;  %v1112_v7 = vpop.permute.xlu0 %1111 }
 0x3c4   : > { %2289 = vmatmul.mubr.msk.bf16.vlgmr.msra.gmra.mrb[4].mxu1 %vm769_vm2, %v3185_v48  ;;  %2295 = vmatmul.mubr.msk.bf16.vlgmr.msra.gmra.mrb[8].mxu0 %vm769_vm2, %v3183_v47  ;;  %v1068_v8 = vsel %vm769_vm2, %v1063_v6, 0  ;;  %v1117_v9 = vsel %vm769_vm2, %v1112_v7, 0 }
 0x3c5   : > { %2299 = vmatpush3.bf16.xpose.msra.mxu1 %v970_v4  ;;  %2305 = vmatpush3.bf16.xpose.msra.mxu0 %v1019_v5 }
 0x3c6   : > { %2300 = vmatprep.mubr.msk.bf16.mxu1 %vm2788_vm1, %v2787_v15  ;;  %2306 = vmatprep.mubr.msk.bf16.mxu0 %vm2788_vm1, %v2787_v15 }
 0x3c7   : > { %2310 = vmatprep.subr.bf16.mxu1 %v2787_v15  ;;  %2316 = vmatprep.subr.bf16.mxu0 %v2787_v15  ;;  %v1264_v10 = vpop.permute.xlu1 %1263 }
 0x3c8   : > { %v1270_v11 = vsel %vm1268_vm3, %v1264_v10, 0 }
 0x3cc   : > { %2301 = vmatmul.mubr.msk.bf16.vlgmr.msra.gmra.mrb[8].mxu1 %vm769_vm2, %v3194_v53  ;;  %2307 = vmatmul.mubr.msk.bf16.vlgmr.msra.gmra.mrb[12].mxu0 %vm769_vm2, %v3192_v52 }
 0x3cd   : > { %2311 = vmatpush3.bf16.xpose.msra.mxu1 %v1068_v8  ;;  %2317 = vmatpush3.bf16.xpose.msra.mxu0 %v1117_v9 }
 0x3ce   : > { %2312 = vmatprep.mubr.msk.bf16.mxu1 %vm2788_vm1, %v2787_v15  ;;  %2318 = vmatprep.mubr.msk.bf16.mxu0 %vm2788_vm1, %v2787_v15 }
 0x3cf   : > { %2322 = vmatprep.subr.bf16.mxu1 %v2787_v15  ;;  %2328 = vmatprep.subr.bf16.mxu0 %v2787_v15 }
 0x3d4   : > { %2313 = vmatmul.mubr.msk.bf16.vlgmr.msra.gmra.mrb[12].mxu1 %vm769_vm2, %v3204_v59  ;;  %2319 = vmatmul.mubr.msk.bf16.vlgmr.msra.gmra.mrb[16].mxu0 %vm769_vm2, %v3202_v58 }
 0x3d5   : > { %2323 = vmatpush3.bf16.msra.mxu1 %v1270_v11  ;;  %2330 = vmatprep.mubr.msk.bf16.mxu0 %vm2788_vm1, %v2787_v15 }
 0x3d6   : > { %2324 = vmatprep.mubr.msk.bf16.mxu1 %vm2788_vm1, %v2787_v15  ;;  %2334 = vmatprep.subr.bf16.mxu1 %v2787_v15 }
 0x425   : > { %v859_v12 = vpop.f32.mrb[4].mxu0 }
 0x426   : > { %v1160_v13 = vmul.f32 0.35355338, %v859_v12  ;;  %v2284_v14 = vpop.f32.mrb[5].mxu0 }
 0x427   : > { %v862_v16 = vpop.f32.mrb[6].mxu0 }
 0x428   : > { %v2285_v17 = vpop.f32.mrb[7].mxu0  ;;  %v810_v18 = vpop.f32.mrb[0].mxu1  ;;  %v1170_v19 = vsel %vm769_vm2, %v1160_v13, -inf }
 0x429   : > { %v1159_v20 = vmul.f32 0.35355338, %v810_v18  ;;  %1171 = vmax.xlane.f32.xlu0 %v1170_v19  ;;  %v2278_v21 = vpop.f32.mrb[1].mxu1 }
 0x42a   : > { %v813_v22 = vpop.f32.mrb[2].mxu1 }
 0x42b   : > { %v2279_v23 = vpop.f32.mrb[3].mxu1  ;;  %v1167_v24 = vsel %vm769_vm2, %v1159_v20, -inf }
 0x42c   : > { %1168 = vmax.xlane.f32.xlu1 %v1167_v24 }
 0x497   : > { %v908_v25 = vpop.f32.mrb[4].mxu1  ;;  %v957_v26 = vpop.f32.mrb[8].mxu0 }
 0x498   : > { %v1161_v27 = vmul.f32 0.35355338, %v908_v25  ;;  %v2290_v28 = vpop.f32.mrb[5].mxu1  ;;  %v2296_v29 = vpop.f32.mrb[9].mxu0  ;;  %v1162_v32 = vmul.f32 0.35355338, %v957_v26 }
 0x499   : > { %v911_v30 = vpop.f32.mrb[6].mxu1  ;;  %v960_v31 = vpop.f32.mrb[10].mxu0 }
 0x49a   : > { %v2291_v33 = vpop.f32.mrb[7].mxu1  ;;  %v2297_v34 = vpop.f32.mrb[11].mxu0  ;;  %v1173_v35 = vsel %vm769_vm2, %v1161_v27, -inf  ;;  %v1176_v36 = vsel %vm769_vm2, %v1162_v32, -inf }
 0x49b   : > { %1174 = vmax.xlane.f32.xlu0 %v1173_v35 }
 0x49f   : > { %v1006_v37 = vpop.f32.mrb[8].mxu1  ;;  %1177 = vmax.xlane.f32.xlu0 %v1176_v36  ;;  %v1055_v38 = vpop.f32.mrb[12].mxu0 }
 0x4a0   : > { %v1163_v40 = vmul.f32 0.35355338, %v1006_v37  ;;  %v3261_v41 = vmul.f32 0.35355338, %v1055_v38  ;;  %v2302_v42 = vpop.f32.mrb[9].mxu1  ;;  %v2308_v43 = vpop.f32.mrb[13].mxu0 }
 0x4a1   : > { %v1009_v44 = vpop.f32.mrb[10].mxu1  ;;  %v1058_v45 = vpop.f32.mrb[14].mxu0 }
 0x4a2   : > { %v2303_v46 = vpop.f32.mrb[11].mxu1  ;;  %v2309_v49 = vpop.f32.mrb[15].mxu0  ;;  %v1179_v50 = vsel %vm769_vm2, %v1163_v40, -inf  ;;  %v1182_v51 = vsel %vm769_vm2, %v3261_v41, -inf }
 0x4a3   : > { %1180 = vmax.xlane.f32.xlu1 %v1179_v50  ;;  %1183 = vmax.xlane.f32.xlu0 %v1182_v51 }
 0x4a7   : > { %v1104_v54 = vpop.f32.mrb[12].mxu1  ;;  %v1153_v55 = vpop.f32.mrb[16].mxu0 }
 0x4a8   : > { %v1165_v56 = vmul.f32 0.35355338, %v1104_v54  ;;  %v3266_v57 = vmul.f32 0.35355338, %v1153_v55  ;;  %v2314_v60 = vpop.f32.mrb[13].mxu1  ;;  %v2320_v61 = vpop.f32.mrb[17].mxu0 }
 0x4a9   : > { %v1107_v62 = vpop.f32.mrb[14].mxu1  ;;  %v1156_v63 = vpop.f32.mrb[18].mxu0 }
 0x4aa   : > { %v2315_v2 = vpop.f32.mrb[15].mxu1  ;;  %v2321_v3 = vpop.f32.mrb[19].mxu0  ;;  %v1185_v4 = vsel %vm769_vm2, %v1165_v56, -inf  ;;  %v1188_v5 = vsel %vm769_vm2, %v3266_v57, -inf }
 0x4ab   : > { %1186 = vmax.xlane.f32.xlu1 %v1185_v4  ;;  %1189 = vmax.xlane.f32.xlu0 %v1188_v5 }
 0x4b6   : > { %v1172_v6 = vpop.xlane.xlu0 %1171 }
 0x4b7   : > { %v1192_v7 = vsub.f32 %v1160_v13, %v1172_v6 }
 0x4b9   : > { %v1169_v8 = vpop.xlane.xlu1 %1168  ;;  %v1201_v9 = vmul.f32 1.442695, %v1192_v7 }
 0x4ba   : > { %v1191_v10 = vsub.f32 %v1159_v20, %v1169_v8 }
 0x4bb   : > { %2518 = vpow2.f32 %v1201_v9 }
 0x4bc   : > { %1360 = vrot.lane.b32.xlu1 %v3185_v48, %s2793_s24  ;;  %v1199_v11 = vmul.f32 1.442695, %v1191_v10 }
 0x4be   : > { %2520 = vpow2.f32 %v1199_v11 }
 0x4c0   : > { %1408 = vrot.lane.b32.xlu1 %v3183_v47, %s2793_s24 }
 0x4c1   : > { %1312 = vrot.lane.b32.xlu0 %v3178_v39, %s2793_s24 }
 0x4c5   : > { %v2519_v12 = vpop.eup %2518 }
 0x4c6   : > { %v1218_v14 = vsel %vm769_vm2, %v2519_v12, 0.0 }
 0x4c8   : > { %v3278_v16 = vpop.eup %2520 }
 0x4c9   : > { %v1215_v47 = vsel %vm769_vm2, %v3278_v16, 0.0 }
 0x4e0   : > { %1219 = vadd.xlane.f32.xlu0 %v1218_v14 }
 0x4e4   : > { %1216 = vadd.xlane.f32.xlu1 %v1215_v47 }
 0x4f5   : > { %1456 = vrot.lane.b32.xlu1 %v3194_v53, %s2793_s24 }
 0x528   : > { %v1175_v39 = vpop.xlane.xlu0 %1174 }
 0x529   : > { %v1193_v48 = vsub.f32 %v1161_v27, %v1175_v39 }
 0x52b   : > { %v1203_v13 = vmul.f32 1.442695, %v1193_v48 }
 0x52c   : > { %v1178_v17 = vpop.xlane.xlu0 %1177 }
 0x52d   : > { %2522 = vpow2.f32 %v1203_v13  ;;  %v1194_v18 = vsub.f32 %v1162_v32, %v1178_v17 }
 0x52f   : > { %v1205_v19 = vmul.f32 1.442695, %v1194_v18 }
 0x530   : > { %v1181_v20 = vpop.xlane.xlu1 %1180  ;;  %v1184_v23 = vpop.xlane.xlu0 %1183 }
 0x531   : > { %2524 = vpow2.f32 %v1205_v19  ;;  %v1195_v21 = vsub.f32 %v1163_v40, %v1181_v20  ;;  %v1196_v37 = vsub.f32 %v3261_v41, %v1184_v23 }
 0x533   : > { %v1207_v22 = vmul.f32 1.442695, %v1195_v21  ;;  %v1209_v38 = vmul.f32 1.442695, %v1196_v37 }
 0x535   : > { %2526 = vpow2.f32 %v1207_v22 }
 0x537   : > { %v3284_v24 = vpop.eup %2522 }
 0x538   : > { %v1187_v25 = vpop.xlane.xlu1 %1186  ;;  %v1190_v26 = vpop.xlane.xlu0 %1189  ;;  %v1221_v53 = vsel %vm769_vm2, %v3284_v24, 0.0 }
 0x539   : > { %v1197_v28 = vsub.f32 %v1165_v56, %v1187_v25  ;;  %1222 = vadd.xlane.f32.xlu1 %v1221_v53  ;;  %v1198_v40 = vsub.f32 %v3266_v57, %v1190_v26 }
 0x53b   : > { %v3288_v27 = vpop.eup %2524  ;;  %v1211_v29 = vmul.f32 1.442695, %v1197_v28  ;;  %v1213_v42 = vmul.f32 1.442695, %v1198_v40 }
 0x53c   : > { %v1313_v30 = vpop.permute.xlu0 %1312  ;;  %v1224_v31 = vsel %vm769_vm2, %v3288_v27, 0.0  ;;  %v1361_v43 = vpop.permute.xlu1 %1360 }
 0x53d   : > { %2528 = vpow2.f32 %v1211_v29  ;;  %v1318_v32 = vsel %vm1268_vm3, %v1313_v30, 0  ;;  %1225 = vadd.xlane.f32.xlu0 %v1224_v31  ;;  %v1366_v61 = vsel %vm1268_vm3, %v1361_v43, 0 }
 0x53e   : > { %2329 = vmatpush3.bf16.msra.mxu0 %v1318_v32  ;;  %2530 = vpow2.f32 %v1209_v38 }
 0x53f   : > { %v3293_v33 = vpop.eup %2526  ;;  %2340 = vmatprep.subr.bf16.mxu0 %v2787_v15  ;;  %2532 = vpow2.f32 %v1213_v42 }
 0x540   : > { %v1227_v34 = vsel %vm769_vm2, %v3293_v33, 0.0  ;;  %v1409_v44 = vpop.permute.xlu1 %1408 }
 0x541   : > { %1228 = vadd.xlane.f32.xlu1 %v1227_v34  ;;  %v1414_v56 = vsel %vm1268_vm3, %v1409_v44, 0 }
 0x547   : > { %v3298_v35 = vpop.eup %2528 }
 0x548   : > { %v1233_v36 = vsel %vm769_vm2, %v3298_v35, 0.0  ;;  %v3308_v46 = vpop.eup %2530 }
 0x549   : > { %1234 = vadd.xlane.f32.xlu1 %v1233_v36  ;;  %v3312_v50 = vpop.eup %2532 }
 0x553   : > { %1504 = vrot.lane.b32.xlu0 %v3192_v52, %s2793_s24  ;;  %v1230_v52 = vsel %vm769_vm2, %v3308_v46, 0.0 }
 0x55a   : > { %1552 = vrot.lane.b32.xlu1 %v3204_v59, %s2793_s24  ;;  %v1236_v59 = vsel %vm769_vm2, %v3312_v50, 0.0 }
 0x56d   : > { %v1220_v45 = vpop.xlane.xlu0 %1219 }
 0x56e   : > { %2534 = vrcp.f32 %v1220_v45 }
 0x571   : > { %v1217_v49 = vpop.xlane.xlu1 %1216 }
 0x572   : > { %2536 = vrcp.f32 %v1217_v49  ;;  %1231 = vadd.xlane.f32.xlu0 %v1230_v52 }
 0x575   : > { %v1457_v62 = vpop.permute.xlu1 %1456 }
 0x576   : > { %1237 = vadd.xlane.f32.xlu0 %v1236_v59  ;;  %v1462_v8 = vsel %vm1268_vm3, %v1457_v62, 0 }
 0x578   : > { %v2535_v41 = vpop.eup %2534 }
 0x579   : > { %v1248_v51 = vmul.f32 %v2535_v41, %v2519_v12 }
 0x57b   : > { %v1256_v54 = vpack.c.bf16 %v1248_v51, %v1248_v51 }
 0x57c   : > { %v2537_v55 = vpop.eup %2536 }
 0x57d   : > { %v1247_v57 = vmul.f32 %v2537_v55, %v3278_v16  ;;  %2331 = vmatmul.mubr.msk.bf16.vlgmr.msra.gmra.mrb[20].mxu0 %vm769_vm2, %v1256_v54 }
 0x57e   : > { %2341 = vmatpush3.bf16.msra.mxu0 %v1414_v56  ;;  %2342 = vmatprep.mubr.msk.bf16.mxu0 %vm2788_vm1, %v2787_v15  ;;  %v2506_v56 = vld [vmem:[%s3084_s16] sm:$0xff]  }
 0x57f   : > { %v1255_v60 = vpack.c.bf16 %v1247_v57, %v1247_v57  ;;  %2352 = vmatprep.subr.bf16.mxu0 %v2787_v15  ;;  %v2507_v57 = vld [vmem:[%s3084_s16 + $0x8] sm:$0xff]   ;;  %s3513_s16 = scalar_lea.vmem [#allocation3], %s3041_s29 }
 0x581   : > { %2325 = vmatmul.mubr.msk.bf16.vlgmr.msra.gmra.mrb[16].mxu1 %vm769_vm2, %v1255_v60 }
 0x582   : > { %2335 = vmatpush3.bf16.msra.mxu1 %v1366_v61  ;;  %2336 = vmatprep.mubr.msk.bf16.mxu1 %vm2788_vm1, %v2787_v15 }
 0x583   : > { %2346 = vmatprep.subr.bf16.mxu1 %v2787_v15 }
 0x58c   : > { %1600 = vrot.lane.b32.xlu0 %v3202_v58, %s2793_s24 }
 0x5c6   : > { %v1223_v63 = vpop.xlane.xlu1 %1222 }
 0x5c7   : > { %2538 = vrcp.f32 %v1223_v63 }
 0x5ca   : > { %v1226_v2 = vpop.xlane.xlu0 %1225 }
 0x5cb   : > { %2540 = vrcp.f32 %v1226_v2 }
 0x5ce   : > { %v1229_v3 = vpop.xlane.xlu1 %1228  ;;  %v1505_v58 = vpop.permute.xlu0 %1504 }
 0x5cf   : > { %2542 = vrcp.f32 %v1229_v3  ;;  %v1510_v16 = vsel %vm1268_vm3, %v1505_v58, 0 }
 0x5d1   : > { %v2539_v4 = vpop.eup %2538 }
 0x5d2   : > { %v1249_v5 = vmul.f32 %v2539_v4, %v3284_v24 }
 0x5d4   : > { %v1257_v6 = vpack.c.bf16 %v1249_v5, %v1249_v5 }
 0x5d5   : > { %v2541_v7 = vpop.eup %2540 }
 0x5d6   : > { %v1250_v9 = vmul.f32 %v2541_v7, %v3288_v27  ;;  %2337 = vmatmul.mubr.msk.bf16.vlgmr.msra.gmra.mrb[20].mxu1 %vm769_vm2, %v1257_v6  ;;  %v1235_v10 = vpop.xlane.xlu1 %1234 }
 0x5d7   : > { %2347 = vmatpush3.bf16.msra.mxu1 %v1462_v8  ;;  %2544 = vrcp.f32 %v1235_v10  ;;  %2348 = vmatprep.mubr.msk.bf16.mxu1 %vm2788_vm1, %v2787_v15 }
 0x5d8   : > { %v1258_v11 = vpack.c.bf16 %v1250_v9, %v1250_v9  ;;  %2358 = vmatprep.subr.bf16.mxu1 %v2787_v15 }
 0x5d9   : > { %v2543_v12 = vpop.eup %2542 }
 0x5da   : > { %v1251_v14 = vmul.f32 %v2543_v12, %v3293_v33  ;;  %2343 = vmatmul.mubr.msk.bf16.vlgmr.msra.gmra.mrb[24].mxu0 %vm769_vm2, %v1258_v11  ;;  %v1553_v47 = vpop.permute.xlu1 %1552 }
 0x5db   : > { %2353 = vmatpush3.bf16.msra.mxu0 %v1510_v16  ;;  %2354 = vmatprep.mubr.msk.bf16.mxu0 %vm2788_vm1, %v2787_v15  ;;  %v1558_v48 = vsel %vm1268_vm3, %v1553_v47, 0 }
 0x5dc   : > { %v1259_v39 = vpack.c.bf16 %v1251_v14, %v1251_v14  ;;  %2364 = vmatprep.subr.bf16.mxu0 %v2787_v15 }
 0x5de   : > { %2349 = vmatmul.mubr.msk.bf16.vlgmr.msra.gmra.mrb[24].mxu1 %vm769_vm2, %v1259_v39 }
 0x5df   : > { %2359 = vmatpush3.bf16.msra.mxu1 %v1558_v48  ;;  %2360 = vmatprep.mubr.msk.bf16.mxu1 %vm2788_vm1, %v2787_v15 }
 0x5e0   : > { %2370 = vmatprep.subr.bf16.mxu1 %v2787_v15 }
 0x5e1   : > { %v2545_v13 = vpop.eup %2544 }
 0x5e2   : > { %v1253_v17 = vmul.f32 %v2545_v13, %v3298_v35 }
 0x5e4   : > { %v1261_v18 = vpack.c.bf16 %v1253_v17, %v1253_v17 }
 0x5e6   : > { %2361 = vmatmul.mubr.msk.bf16.vlgmr.msra.gmra.mrb[28].mxu1 %vm769_vm2, %v1261_v18 }
 0x5e7   : > { %2374 = vmatprep.mubr.msk.bf16.mxu1 %vm2788_vm1, %v2787_v15  ;;  %2371 = vmatpush3.bf16.msra.mxu1 %v2506_v56 }
 0x5e8   : > { %2372 = vmatprep.subr.bf16.mxu1 %v2787_v15 }
 0x5eb   : > { %2373 = vmatpush3.bf16.msra.mxu1 %v2507_v57 }
 0x5ec   : > { %2386 = vmatprep.subr.bf16.mxu1 %v2787_v15 }
 0x5ff   : > { %v1232_v19 = vpop.xlane.xlu0 %1231 }
 0x600   : > { %2546 = vrcp.f32 %v1232_v19 }
 0x603   : > { %v1238_v20 = vpop.xlane.xlu0 %1237 }
 0x604   : > { %2548 = vrcp.f32 %v1238_v20 }
 0x607   : > { %v1601_v23 = vpop.permute.xlu0 %1600 }
 0x608   : > { %v1606_v26 = vsel %vm1268_vm3, %v1601_v23, 0 }
 0x60a   : > { %v2547_v21 = vpop.eup %2546 }
 0x60b   : > { %v1252_v22 = vmul.f32 %v2547_v21, %v3308_v46 }
 0x60d   : > { %v1260_v24 = vpack.c.bf16 %v1252_v22, %v1252_v22  ;;  %v2198_v22 = vld [vmem:[%s3513_s16] ss:$0 sm:$0xff] }
 0x60e   : > { %v2549_v25 = vpop.eup %2548 }
 0x60f   : > { %2355 = vmatmul.mubr.msk.bf16.vlgmr.msra.gmra.mrb[28].mxu0 %vm769_vm2, %v1260_v24  ;;  %v1254_v53 = vmul.f32 %v2549_v25, %v3312_v50 }
 0x610   : > { %2365 = vmatpush3.bf16.msra.mxu0 %v1606_v26  ;;  %2366 = vmatprep.mubr.msk.bf16.mxu0 %vm2788_vm1, %v2787_v15 }
 0x611   : > { %2378 = vmatprep.subr.bf16.mxu0 %v2787_v15  ;;  %v1262_v28 = vpack.c.bf16 %v1254_v53, %v1254_v53 }
 0x617   : > { %2367 = vmatmul.mubr.msk.bf16.vlgmr.msra.gmra.mrb[32].mxu0 %vm769_vm2, %v1262_v28 }
 0x618   : > { %2382 = vmatprep.mubr.msk.bf16.mxu0 %vm2788_vm1, %v2787_v15 }
 0x650   : > { %v1354_v27 = vpop.f32.mrb[20].mxu0 }
 0x651   : > { %v2332_v29 = vpop.f32.mrb[21].mxu0 }
 0x652   : > { %v1357_v30 = vpop.f32.mrb[22].mxu0 }
 0x653   : > { %v2333_v31 = vpop.f32.mrb[23].mxu0 }
 0x654   : > { %v1306_v32 = vpop.f32.mrb[16].mxu1 }
 0x655   : > { %v2326_v33 = vpop.f32.mrb[17].mxu1 }
 0x656   : > { %v1309_v34 = vpop.f32.mrb[18].mxu1 }
 0x657   : > { %v2327_v35 = vpop.f32.mrb[19].mxu1 }
 0x6a9   : > { %v1402_v36 = vpop.f32.mrb[20].mxu1 }
 0x6aa   : > { %v2338_v37 = vpop.f32.mrb[21].mxu1 }
 0x6ab   : > { %v1405_v38 = vpop.f32.mrb[22].mxu1 }
 0x6ac   : > { %v2339_v40 = vpop.f32.mrb[23].mxu1 }
 0x6ad   : > { %v1450_v42 = vpop.f32.mrb[24].mxu0  ;;  %v2508_v40 = vld [vmem:[%s3089_s12] sm:$0xff]  }
 0x6ae   : > { %v2489_v43 = vpack.i.bf16 %v1450_v42, %v1402_v36  ;;  %v2344_v44 = vpop.f32.mrb[25].mxu0  ;;  %2379 = vmatpush3.bf16.msra.mxu0 %v2508_v40  ;;  %v2509_v42 = vld [vmem:[%s3089_s12 + $0x8] sm:$0xff]   ;;  %s3515_s12 = scalar_lea.vmem [#allocation8], %s3041_s29 }
 0x6af   : > { %v1453_v45 = vpop.f32.mrb[26].mxu0  ;;  %2380 = vmatprep.subr.bf16.mxu0 %v2787_v15  ;;  %v2200_v56 = vld [vmem:[%s3515_s12] ss:$0 sm:$0xff] }
 0x6b0   : > { %2490 = vrot.lane.b32.xlu1 %v2489_v43, %s2794_s5  ;;  %v2345_v46 = vpop.f32.mrb[27].mxu0 }
 0x6b1   : > { %v1498_v49 = vpop.f32.mrb[24].mxu1 }
 0x6b2   : > { %v2350_v52 = vpop.f32.mrb[25].mxu1  ;;  %2381 = vmatpush3.bf16.msra.mxu0 %v2509_v42 }
 0x6b3   : > { %v1501_v50 = vpop.f32.mrb[26].mxu1 }
 0x6b4   : > { %v2351_v59 = vpop.f32.mrb[27].mxu1 }
 0x6b9   : > { %v1594_v41 = vpop.f32.mrb[28].mxu1 }
 0x6ba   : > { %v2362_v51 = vpop.f32.mrb[29].mxu1 }
 0x6bb   : > { %v1597_v54 = vpop.f32.mrb[30].mxu1 }
 0x6bc   : > { %v2363_v55 = vpop.f32.mrb[31].mxu1 }
 0x6e2   : > { %v1546_v60 = vpop.f32.mrb[28].mxu0 }
 0x6e3   : > { %v2494_v61 = vpack.i.bf16 %v1546_v60, %v1498_v49  ;;  %v2356_v62 = vpop.f32.mrb[29].mxu0 }
 0x6e4   : > { %v1549_v63 = vpop.f32.mrb[30].mxu0 }
 0x6e5   : > { %2495 = vrot.lane.b32.xlu0 %v2494_v61, %s2795_s7  ;;  %v2357_v2 = vpop.f32.mrb[31].mxu0  ;;  %v2510_v63 = vld [vmem:[%s3094_s30] sm:$0xff]  }
 0x6e6   : > { %v2511_v2 = vld [vmem:[%s3094_s30 + $0x8] sm:$0xff]  }
 0x6ea   : > { %v1642_v3 = vpop.f32.mrb[32].mxu0 }
 0x6eb   : > { %v2499_v4 = vpack.i.bf16 %v1642_v3, %v1594_v41  ;;  %v2368_v5 = vpop.f32.mrb[33].mxu0  ;;  %v2199_v41 = vld [vmem:[%s3514_s28] ss:$0 sm:$0xff]  ;;  %v2512_v3 = vld [vmem:[%s3094_s30 + $0x10] sm:$0xff]  }
 0x6ec   : > { %v1645_v6 = vpop.f32.mrb[34].mxu0  ;;  %v2201_v5 = vld [vmem:[%s3516_s23] ss:$0 sm:$0xff] }
 0x6ed   : > { %2500 = vrot.lane.b32.xlu1 %v2499_v4, %s2796_s0  ;;  %v2369_v7 = vpop.f32.mrb[35].mxu0  ;;  %v2513_v4 = vld [vmem:[%s3094_s30 + $0x18] sm:$0xff]  }
 0x722   : > { %v2491_v8 = vpop.permute.xlu1 %2490 }
 0x723   : > { %v2493_v10 = vunpack.i.h.bf16 %v2491_v8  ;;  %v2492_v58 = vunpack.i.l.bf16 %v2491_v8 }
 0x725   : > { %v1673_v16 = vsel %vm769_vm2, %v1354_v27, %v2493_v10  ;;  %v1672_v47 = vsel %vm769_vm2, %v1306_v32, %v2492_v58 }
 0x757   : > { %v2496_v9 = vpop.permute.xlu0 %2495 }
 0x758   : > { %v2498_v11 = vunpack.i.h.bf16 %v2496_v9  ;;  %v2497_v12 = vunpack.i.l.bf16 %v2496_v9 }
 0x75a   : > { %v1676_v13 = vsel %vm1674_vm4, %v1673_v16, %v2498_v11  ;;  %v1675_v17 = vsel %vm1674_vm4, %v1672_v47, %v2497_v12 }
 0x75f   : > { %v2501_v14 = vpop.permute.xlu1 %2500 }
 0x760   : > { %v2503_v39 = vunpack.i.h.bf16 %v2501_v14  ;;  %v2502_v48 = vunpack.i.l.bf16 %v2501_v14 }
 0x762   : > { %v1679_v18 = vsel %vm1677_vm5, %v1676_v13, %v2503_v39  ;;  %v1678_v19 = vsel %vm1677_vm5, %v1675_v17, %v2502_v48 }
 0x763   : > { %v1680_v20 = vpack.c.bf16 %v1679_v18, %v1678_v19  ;;  %v2205_v19 = vld [vmem:[%s608_s15] ss:$0 sm:$0xff] }
 0x765   : > { %2375 = vmatmul.mubr.msk.bf16.vlgmr.msra.gmra.mrb[32].mxu1 %vm633_vm0, %v1680_v20 }
 0x766   : > { %2394 = vmatprep.mubr.msk.bf16.mxu1 %vm2788_vm1, %v2787_v15  ;;  %2387 = vmatpush3.bf16.msra.mxu1 %v2510_v63 }
 0x767   : > { %2388 = vmatprep.subr.bf16.mxu1 %v2787_v15 }
 0x76a   : > { %2389 = vmatpush3.bf16.msra.mxu1 %v2511_v2 }
 0x76b   : > { %2390 = vmatprep.subr.bf16.mxu1 %v2787_v15 }
 0x76e   : > { %2391 = vmatpush3.bf16.msra.mxu1 %v2512_v3 }
 0x76f   : > { %2392 = vmatprep.subr.bf16.mxu1 %v2787_v15 }
 0x772   : > { %2393 = vmatpush3.bf16.msra.mxu1 %v2513_v4 }
 0x838   : > { %v1734_v21 = vpop.f32.mrb[32].mxu1 }
 0x839   : > { %v1741_v23 = vadd.f32 %v1734_v21, %v3143_v0  ;;  %v2376_v24 = vpop.f32.mrb[33].mxu1 }
 0x83a   : > { %v1737_v25 = vpop.f32.mrb[34].mxu1 }
 0x83b   : > { %v3374_v26 = vadd.f32 %v2198_v22, %v1741_v23  ;;  %v1742_v53 = vadd.f32 %v1737_v25, %v3145_v1  ;;  %v2377_v28 = vpop.f32.mrb[35].mxu1 }
 0x83d   : > { %v3377_v27 = vadd.f32 %v2198_v22, %v1742_v53  ;;  %v1754_v29 = vsel %vm633_vm0, %v3374_v26, 0.0 }
 0x83e   : > { %1755 = vadd.xlane.f32.xlu0 %v1754_v29 }
 0x83f   : > { %v1757_v30 = vsel %vm633_vm0, %v3377_v27, 0.0 }
 0x840   : > { %1758 = vadd.xlane.f32.xlu1 %v1757_v30 }
 0x8cb   : > { %v1756_v0 = vpop.xlane.xlu0 %1755 }
 0x8cc   : > { %v1760_v31 = vmul.f32 0.03125, %v1756_v0 }
 0x8cd   : > { %v1759_v32 = vpop.xlane.xlu1 %1758 }
 0x8ce   : > { %v1762_v33 = vsub.f32 %v3374_v26, %v1760_v31  ;;  %v1761_v34 = vmul.f32 0.03125, %v1759_v32 }
 0x8d0   : > { %v1763_v1 = vsub.f32 %v3377_v27, %v1761_v34  ;;  %v1764_v35 = vmul.f32 %v1762_v33, %v1762_v33 }
 0x8d2   : > { %v1766_v36 = vsel %vm633_vm0, %v1764_v35, 0.0  ;;  %v1765_v37 = vmul.f32 %v1763_v1, %v1763_v1 }
 0x8d3   : > { %1767 = vadd.xlane.f32.xlu0 %v1766_v36 }
 0x8d4   : > { %v1769_v38 = vsel %vm633_vm0, %v1765_v37, 0.0 }
 0x8d7   : > { %1770 = vadd.xlane.f32.xlu0 %v1769_v38 }
 0x960   : > { %v1768_v43 = vpop.xlane.xlu0 %1767 }
 0x961   : > { %v1772_v44 = vmul.f32 0.03125, %v1768_v43 }
 0x963   : > { %v1774_v45 = vadd.f32 1e-05, %v1772_v44 }
 0x964   : > { %v1771_v46 = vpop.xlane.xlu0 %1770 }
 0x965   : > { %2550 = vrsqrt.f32 %v1774_v45  ;;  %v1773_v49 = vmul.f32 0.03125, %v1771_v46 }
 0x967   : > { %v1775_v52 = vadd.f32 1e-05, %v1773_v49 }
 0x969   : > { %2552 = vrsqrt.f32 %v1775_v52 }
 0x96f   : > { %v2551_v50 = vpop.eup %2550 }
 0x970   : > { %v1778_v59 = vmul.f32 %v2551_v50, %v1762_v33 }
 0x972   : > { %v1786_v54 = vmul.f32 %v2199_v41, %v1778_v59 }
 0x973   : > { %v2553_v51 = vpop.eup %2552 }
 0x974   : > { %v1779_v55 = vmul.f32 %v2553_v51, %v1763_v1  ;;  %v1794_v60 = vadd.f32 %v2200_v56, %v1786_v54 }
 0x976   : > { %v1787_v57 = vmul.f32 %v2199_v41, %v1779_v55 }
 0x978   : > { %v1795_v61 = vadd.f32 %v2200_v56, %v1787_v57 }
 0x97a   : > { %v1796_v62 = vpack.c.bf16 %v1795_v61, %v1794_v60 }
 0x97c   : > { %2383 = vmatmul.mubr.msk.bf16.vlgmr.msra.gmra.mrb[36].mxu0 %vm633_vm0, %v1796_v62 }
 0xa4f   : > { %v1857_v6 = vpop.f32.mrb[36].mxu0 }
 0xa50   : > { %v1858_v7 = vadd.f32 %v2201_v5, %v1857_v6  ;;  %v2384_v8 = vpop.f32.mrb[37].mxu0 }
 0xa51   : > { %v1860_v9 = vpop.f32.mrb[38].mxu0 }
 0xa52   : > { %v1866_v10 = vmul.f32 0.70710677, %v1858_v7  ;;  %v1861_v58 = vadd.f32 %v2201_v5, %v1860_v9  ;;  %v2385_v11 = vpop.f32.mrb[39].mxu0  ;;  %v1864_v39 = vmul.f32 0.5, %v1858_v7 }
 0xa54   : > { %2554 = verf.f32 %v1866_v10  ;;  %v1867_v12 = vmul.f32 0.70710677, %v1861_v58  ;;  %v1865_v15 = vmul.f32 0.5, %v1861_v58 }
 0xa56   : > { %2556 = verf.f32 %v1867_v12 }
 0xa5e   : > { %v2555_v14 = vpop.eup %2554 }
 0xa5f   : > { %v1870_v16 = vadd.f32 1.0, %v2555_v14 }
 0xa60   : > { %v2557_v47 = vpop.eup %2556 }
 0xa61   : > { %v1871_v48 = vadd.f32 1.0, %v2557_v47  ;;  %v1872_v13 = vmul.f32 %v1870_v16, %v1864_v39 }
 0xa63   : > { %v1873_v17 = vmul.f32 %v1871_v48, %v1865_v15 }
 0xa65   : > { %v1874_v18 = vpack.c.bf16 %v1873_v17, %v1872_v13 }
 0xa67   : > { %2395 = vmatmul.mubr.msk.bf16.vlgmr.msra.gmra.mrb[36].mxu1 %vm1914_vm6, %v1874_v18 }
 0xb3a   : > { %v1952_v20 = vpop.f32.mrb[36].mxu1 }
 0xb3b   : > { %v1953_v21 = vadd.f32 %v2205_v19, %v1952_v20  ;;  %v2396_v22 = vpop.f32.mrb[37].mxu1 }
 0xb3c   : > { %v1955_v23 = vpop.f32.mrb[38].mxu1 }
 0xb3d   : > { %v1959_v24 = vadd.f32 %v1953_v21, %v3374_v26  ;;  %v1956_v25 = vadd.f32 %v2205_v19, %v1955_v23  ;;  %v2397_v53 = vpop.f32.mrb[39].mxu1 }
 0xb3f   : > { %1961 = vst.msk [vmem:[#allocation11] sm:$0xff] %vm633_vm0, %v1959_v24  ;;  %v1960_v28 = vadd.f32 %v1956_v25, %v3377_v27 }
 0xb41   : > { %1962 = vst.msk [vmem:[#allocation11 + $0x8] sm:$0xff] %vm633_vm0, %v1960_v28 }
 0xb42   : > { %2717 = shalt.err (!%p2714_p6)
}
 0xb43   : > { %s3517_s27 = sld [smem:[#allocation30_spill]] }
 0xb49   : > { %s2718_s14 = scalar_lea.hbm %s3517_s27, 256 }
 0xb4a   : > { %p2719_p3 = scmp.ne.s32.totalorder %s3517_s27, %s2718_s14  ;;  %p2724_p10 = scmp.lt.u32.totalorder %s2718_s14, %s3517_s27 }
 0xb4c   : > { %p2720_p1 = pnand %p2719_p3, %p2428_p4 }
 0xb4e   : > { %p2721_p13 = pneg %p2720_p1 }
 0xb50   : > { %p2726_p0 = pnand %p2724_p10, %p2721_p13 }
 0xb52   : > { %2729 = shalt.err (!%p2726_p0)
}
 0xb53   : > { %s2797_s13 = smov 128  }
 0xb54   : > { %2410 = dma.vmem_to_hbm [thread:$0]  (%p2428_p4), %s3100_s26, 256, %s3517_s27, [#allocation5], %s2797_s13, %s2797_s13, %s2794_s5  }
 0xb55   : > { %2763 = dma.done.wait (%p2428_p4), [#allocation5], 256  }
 0xb56   : > { %2765 = vsyncadd (%p2428_p4), [#allocation5], 4294967040 }
 0xb57 PF: > { %s3518_s24 = sld [smem:[#allocation22_spill]]  ;;  %s3519_s7 = sld [smem:[#allocation21_spill]] }
 0xb58   : > { %s3520_s23 = sld [smem:[#allocation23_spill]]  ;;  %s3521_s21 = smov %s2772_s22 }
 0xb5d   : > { %p29_p11 = scmp.ge.s32.totalorder %s3518_s24, 4   ;;  %s3522_s22 = smov %s3519_s7 }
 0xb5f   :  { %31 = sbr.rel (!%p29_p11) target bundleno = 16 (0x10), region = 167 }
 0xb66   :  { %1985 = vsyncpa [#allocation4], 1 }
 0xb67   :  { %1987 = vsyncpa [#allocation4 + $0x1], 1 }
 0xb68   :  { %1988 = vsyncpa [#allocation7], 1 }
 0xb69   :  { %1990 = vsyncpa [#allocation7 + $0x1], 1 }
 0xb6a   :  { %1991 = vsyncpa [#allocation10], 1 }
 0xb6b   :  { %1993 = vsyncpa [#allocation10 + $0x1], 1 }
 0xb6c   :  { %1994 = vsyncpa [#allocation5], 1 }
 0xb6d   :  { %1996 = vsyncpa [#allocation5 + $0x1], 1 }
 0xb6e   :  { %1997 = vsyncmov [#allocation2] }
 0xb71   :  { %s1998_s25 = vpop.sfrf %1997 }
 0xb72   :  { %p2215_p12 = scmp.ne.s32.totalorder %s1998_s25, 0 }
 0xb74   :  { %2002 = shalt.err (%p2215_p12)  }

</bundles_post_ra>
